<compile_context>
chip_gen: v7x
topology: tpu7x:2x2x1
jax: 0.10.0
libtpu: 0.0.40
codegen_flags: <defaults>
</compile_context>

<pallas_src>
import jax
import jax.numpy as jnp
from jax.experimental import pallas as pl
from jax.experimental.pallas import tpu as pltpu

_LANE = 128
_NEG_SAT = -40.0  # tanh(0.5 * -40) == -1.0 in f32 -> sigmoid of padded cols == 0.0


def _round_up(n, m):
    return (n + m - 1) // m * m


def _pick_batch_tile(batch, requested):
    """Pick the batch tile (rows per grid step)."""
    pb8 = _round_up(max(batch, 8), 8)
    if requested is not None:
        return min(_round_up(requested, 8), pb8)
    # Fat tiles amortize the ~0.35us per-grid-step overhead (this kernel is
    # DMA/overhead-bound, not MXU-bound).  Cap at 2048 rows so the
    # double-buffered x/out tiles plus f32 intermediates stay ~6 MiB: under
    # v5e's 16 MiB scoped-VMEM default and well inside v7x's 64 MiB physical
    # VMEM per TensorCore.  For large batches aim for >=4 grid steps so a v7x
    # megacore gets >=2 pipelined steps per core; tiny batches take 1-2 steps.
    if pb8 <= 512:
        return min(pb8, 256)
    return min(2048, _round_up(pl.cdiv(pb8, 4), 8))


def _pick_subtiles(tb):
    """Split the batch tile into independent sub-chunks to overlap MXU chains."""
    for n in (4, 2):
        sub = tb // n
        if tb % n == 0 and sub % 8 == 0 and sub >= 64:
            return n
    return 1


def _make_kernel(n_sub, sub_rows):
    def kernel(x_ref, w1_ref, b1_ref, w2_ref, b2_ref, w3_ref, b3_ref, o_ref):
        # Hoist weight/bias loads out of the sub-chunk loop.
        w1 = w1_ref[...]
        b1 = b1_ref[...]
        w2 = w2_ref[...]
        b2 = b2_ref[...]
        w3 = w3_ref[...]
        b3 = b3_ref[...]
        # Static Python loop -> independent per-chunk MXU chains the scheduler
        # can interleave (chunk j+1 layer-1 overlaps chunk j layer-2/3).
        for c in range(n_sub):
            r0 = c * sub_rows
            x = x_ref[pl.ds(r0, sub_rows), :]

            # l1 + ReLU   (Dropout(p=0.05) is the identity at inference)
            h = jnp.dot(x, w1, preferred_element_type=jnp.float32) + b1
            h = jnp.maximum(h, 0.0)

            # l2 (eval-mode BatchNorm1d already folded into w2/b2) + ReLU
            h = jnp.dot(h.astype(w2.dtype), w2,
                        preferred_element_type=jnp.float32) + b2
            h = jnp.maximum(h, 0.0)

            # l3 + Sigmoid.  sigmoid(x) == 0.5*(tanh(x/2)+1): exact, and tanh
            # runs on the otherwise-idle EUP slot.  Padded l3 bias columns are
            # -40, so padded output lanes come out as exactly 0.0.
            h = jnp.dot(h.astype(w3.dtype), w3,
                        preferred_element_type=jnp.float32) + b3
            o_ref[pl.ds(r0, sub_rows), :] = (
                0.5 * (jnp.tanh(0.5 * h) + 1.0)).astype(o_ref.dtype)

    return kernel


def distillnet_forward(x, params, *, block_batch=None,
                       compute_dtype=jnp.bfloat16,
                       out_dtype=jnp.float32,
                       slice_output=True):
    """Fused DistillNet forward (inference mode).

    block_batch: rows per grid step (auto-picked if None).
    compute_dtype: matmul-operand dtype (bf16 default; f32 accumulation).
    out_dtype: dtype of the stored output (bf16 halves writeback bytes).
    slice_output: if False, return the lane/row-padded (pb, 128) buffer
        (padded columns are exact zeros), skipping the wrapper slice pass.
    """
    (w1, b1, w2, b2, gamma, beta, rmean, rvar, w3, b3) = params
    batch, in_f = x.shape
    h1, h2, nc = w1.shape[1], w2.shape[1], w3.shape[1]

    # ---- Fold eval-mode BatchNorm1d into l2 (exact transformation) ----------
    s = gamma * jax.lax.rsqrt(rvar + 1e-5)              # (1, h2)
    w2f = w2 * s                                        # scale output columns
    b2f = (b2 - rmean) * s + beta

    # ---- Pad hidden / output widths to lane multiples ------------------------
    H1, H2, NC = (_round_up(h1, _LANE), _round_up(h2, _LANE), _round_up(nc, _LANE))
    w1p = jnp.pad(w1, ((0, 0), (0, H1 - h1))).astype(compute_dtype)
    b1p = jnp.pad(b1, ((0, 0), (0, H1 - h1))).astype(jnp.float32)
    w2p = jnp.pad(w2f, ((0, H1 - h1), (0, H2 - h2))).astype(compute_dtype)
    b2p = jnp.pad(b2f, ((0, 0), (0, H2 - h2))).astype(jnp.float32)
    w3p = jnp.pad(w3, ((0, H2 - h2), (0, NC - nc))).astype(compute_dtype)
    # Padded l3 bias columns are a large negative so sigmoid() of them is 0.0.
    b3p = jnp.pad(b3, ((0, 0), (0, NC - nc)),
                  constant_values=_NEG_SAT).astype(jnp.float32)

    # ---- Tile the batch axis; weights stay resident across grid steps -------
    tb = _pick_batch_tile(batch, block_batch)
    pb = _round_up(batch, tb)
    xp = x if pb == batch else jnp.pad(x, ((0, pb - batch), (0, 0)))
    xp = xp.astype(compute_dtype)

    n_sub = _pick_subtiles(tb)
    kernel = _make_kernel(n_sub, tb // n_sub)

    resident = lambda a: pl.BlockSpec(a.shape, lambda i: (0, 0))

    out = pl.pallas_call(
        kernel,
        out_shape=jax.ShapeDtypeStruct((pb, NC), out_dtype),
        grid=(pb // tb,),
        in_specs=[pl.BlockSpec((tb, in_f), lambda i: (i, 0)),
                  resident(w1p), resident(b1p),
                  resident(w2p), resident(b2p),
                  resident(w3p), resident(b3p)],
        out_specs=pl.BlockSpec((tb, NC), lambda i: (i, 0)),
        compiler_params=pltpu.CompilerParams(
            dimension_semantics=("parallel",)),
    )(xp, w1p, b1p, w2p, b2p, w3p, b3p)

    if slice_output:
        return out[:batch, :nc]
    return out  # padded rows contain bias-only activations; padded cols are 0.


def init_params(key, input_size, h1, h2, num_classes):
    """Deterministic PyTorch-style init (uniform +/- 1/sqrt(fan_in))."""
    ks = jax.random.split(key, 6)

    def linear(kw, kb, fan_in, fan_out):
        bound = 1.0 / jnp.sqrt(fan_in)
        w = jax.random.uniform(kw, (fan_in, fan_out), jnp.float32, -bound, bound)
        b = jax.random.uniform(kb, (1, fan_out), jnp.float32, -bound, bound)
        return w, b

    w1, b1 = linear(ks[0], ks[1], input_size, h1)
    w2, b2 = linear(ks[2], ks[3], h1, h2)
    w3, b3 = linear(ks[4], ks[5], h2, num_classes)

    # BatchNorm1d(h2): non-trivial deterministic eval-mode stats so BN is exercised.
    gamma = jnp.ones((1, h2), jnp.float32) * 1.1
    beta = jnp.ones((1, h2), jnp.float32) * 0.05
    rmean = jnp.linspace(-0.2, 0.2, h2, dtype=jnp.float32).reshape(1, h2)
    rvar = jnp.linspace(0.8, 1.2, h2, dtype=jnp.float32).reshape(1, h2)

    return (w1, b1, w2, b2, gamma, beta, rmean, rvar, w3, b3)


def reference_forward(x, params):
    """Pure-JAX reference (un-folded BN, exact sigmoid) for correctness check."""
    (w1, b1, w2, b2, gamma, beta, rmean, rvar, w3, b3) = params
    h1 = jnp.maximum(x @ w1 + b1, 0.0)
    h2 = h1 @ w2 + b2
    h2 = (h2 - rmean) * jax.lax.rsqrt(rvar + 1e-5) * gamma + beta
    h2 = jnp.maximum(h2, 0.0)
    return jax.nn.sigmoid(h2 @ w3 + b3)


if __name__ == "__main__":
    # Shapes consistent with the module's MLP structure; batch large enough to
    # exercise the multi-step grid (tb=256 -> grid of 4, >=2 steps per v7x core)
    # while every tensor stays tiny (~128 KiB of input).
    batch, input_size, hidden_l1, hidden_l2, num_classes = 1024, 32, 64, 32, 8

    key = jax.random.PRNGKey(0)
    kx, kp = jax.random.split(key)
    x = jax.random.normal(kx, (batch, input_size), jnp.float32)
    params = init_params(kp, input_size, hidden_l1, hidden_l2, num_classes)

    ref = reference_forward(x, params)

    # f32-operand path: tight tolerance.
    out_f32 = distillnet_forward(x, params, compute_dtype=jnp.float32)
    out_f32 = jax.block_until_ready(out_f32)
    assert out_f32.shape == (batch, num_classes)
    assert jnp.allclose(out_f32, ref, atol=1e-4, rtol=1e-4)

    # Default bf16-operand path (halves DMA bytes, native MXU rate): looser
    # tolerance, since operands are rounded to bf16 (accumulation stays f32).
    out_bf16 = distillnet_forward(x, params)
    out_bf16 = jax.block_until_ready(out_bf16)
    assert out_bf16.shape == (batch, num_classes)
    assert jnp.allclose(out_bf16, ref, atol=3e-2, rtol=3e-2)

    # TODO(synk): training-mode Dropout mask / BatchNorm batch statistics are
    # not implemented (inference-only kernel by construction).
    print("KERNEL_OK")
</pallas_src>

<mosaic_0001>
module attributes {stable_mosaic.version = 11 : i64} {
  func.func @kernel(%arg0: i32, %arg1: memref<256x32xf32, #tpu.memory_space<vmem>>, %arg2: memref<32x128xf32, #tpu.memory_space<vmem>>, %arg3: memref<1x128xf32, #tpu.memory_space<vmem>>, %arg4: memref<128x128xf32, #tpu.memory_space<vmem>>, %arg5: memref<1x128xf32, #tpu.memory_space<vmem>>, %arg6: memref<128x128xf32, #tpu.memory_space<vmem>>, %arg7: memref<1x128xf32, #tpu.memory_space<vmem>>, %arg8: memref<256x128xf32, #tpu.memory_space<vmem>>) attributes {dimension_semantics = [#tpu.dimension_semantics<parallel>], iteration_bounds = array<i64: 4>, scalar_prefetch = 0 : i64, scratch_operands = 0 : i64, tpu.core_type = #tpu.core_type<tc>, window_params = [{transform_indices = @transform_0, window_bounds = array<i64: 256, 32>}, {pipeline_mode = #tpu.pipeline_mode<synchronous>, transform_indices = @transform_1, window_bounds = array<i64: 32, 128>}, {pipeline_mode = #tpu.pipeline_mode<synchronous>, transform_indices = @transform_2, window_bounds = array<i64: 1, 128>}, {pipeline_mode = #tpu.pipeline_mode<synchronous>, transform_indices = @transform_3, window_bounds = array<i64: 128, 128>}, {pipeline_mode = #tpu.pipeline_mode<synchronous>, transform_indices = @transform_4, window_bounds = array<i64: 1, 128>}, {pipeline_mode = #tpu.pipeline_mode<synchronous>, transform_indices = @transform_5, window_bounds = array<i64: 128, 128>}, {pipeline_mode = #tpu.pipeline_mode<synchronous>, transform_indices = @transform_6, window_bounds = array<i64: 1, 128>}, {transform_indices = @transform_7, window_bounds = array<i64: 256, 128>}]} {
    %c0 = arith.constant 0 : index
    %c0_0 = arith.constant 0 : index
    %0 = vector.load %arg2[%c0, %c0_0] : memref<32x128xf32, #tpu.memory_space<vmem>>, vector<32x128xf32>
    %c0_1 = arith.constant 0 : index
    %c0_2 = arith.constant 0 : index
    %1 = vector.load %arg3[%c0_1, %c0_2] : memref<1x128xf32, #tpu.memory_space<vmem>>, vector<1x128xf32>
    %c0_3 = arith.constant 0 : index
    %c0_4 = arith.constant 0 : index
    %2 = vector.load %arg4[%c0_3, %c0_4] : memref<128x128xf32, #tpu.memory_space<vmem>>, vector<128x128xf32>
    %c0_5 = arith.constant 0 : index
    %c0_6 = arith.constant 0 : index
    %3 = vector.load %arg5[%c0_5, %c0_6] : memref<1x128xf32, #tpu.memory_space<vmem>>, vector<1x128xf32>
    %c0_7 = arith.constant 0 : index
    %c0_8 = arith.constant 0 : index
    %4 = vector.load %arg6[%c0_7, %c0_8] : memref<128x128xf32, #tpu.memory_space<vmem>>, vector<128x128xf32>
    %c0_9 = arith.constant 0 : index
    %c0_10 = arith.constant 0 : index
    %5 = vector.load %arg7[%c0_9, %c0_10] : memref<1x128xf32, #tpu.memory_space<vmem>>, vector<1x128xf32>
    %c0_11 = arith.constant 0 : index
    %c0_12 = arith.constant 0 : index
    %6 = vector.load %arg1[%c0_11, %c0_12] : memref<256x32xf32, #tpu.memory_space<vmem>>, vector<64x32xf32>
    %cst = arith.constant dense<0.000000e+00> : vector<64x128xf32>
    %7 = tpu.matmul %6, %0, %cst {dimension_numbers = #tpu.dot_dimension_numbers<[1], [0], [0], [1], [0, 0, 1, 1], [], []>} : vector<64x32xf32>, vector<32x128xf32>, vector<64x128xf32> -> vector<64x128xf32>
    %8 = vector.broadcast %1 : vector<1x128xf32> to vector<64x128xf32>
    %9 = arith.addf %7, %8 : vector<64x128xf32>
    %cst_13 = arith.constant 0.000000e+00 : f32
    %10 = vector.broadcast %cst_13 : f32 to vector<64x128xf32>
    %11 = arith.maximumf %9, %10 : vector<64x128xf32>
    %cst_14 = arith.constant dense<0.000000e+00> : vector<64x128xf32>
    %12 = tpu.matmul %11, %2, %cst_14 {dimension_numbers = #tpu.dot_dimension_numbers<[1], [0], [0], [1], [0, 0, 1, 1], [], []>} : vector<64x128xf32>, vector<128x128xf32>, vector<64x128xf32> -> vector<64x128xf32>
    %13 = vector.broadcast %3 : vector<1x128xf32> to vector<64x128xf32>
    %14 = arith.addf %12, %13 : vector<64x128xf32>
    %cst_15 = arith.constant 0.000000e+00 : f32
    %15 = vector.broadcast %cst_15 : f32 to vector<64x128xf32>
    %16 = arith.maximumf %14, %15 : vector<64x128xf32>
    %cst_16 = arith.constant dense<0.000000e+00> : vector<64x128xf32>
    %17 = tpu.matmul %16, %4, %cst_16 {dimension_numbers = #tpu.dot_dimension_numbers<[1], [0], [0], [1], [0, 0, 1, 1], [], []>} : vector<64x128xf32>, vector<128x128xf32>, vector<64x128xf32> -> vector<64x128xf32>
    %18 = vector.broadcast %5 : vector<1x128xf32> to vector<64x128xf32>
    %19 = arith.addf %17, %18 : vector<64x128xf32>
    %cst_17 = arith.constant 5.000000e-01 : f32
    %20 = vector.broadcast %cst_17 : f32 to vector<64x128xf32>
    %21 = arith.mulf %20, %19 : vector<64x128xf32>
    %22 = math.tanh %21 : vector<64x128xf32>
    %cst_18 = arith.constant 1.000000e+00 : f32
    %23 = vector.broadcast %cst_18 : f32 to vector<64x128xf32>
    %24 = arith.addf %22, %23 : vector<64x128xf32>
    %cst_19 = arith.constant 5.000000e-01 : f32
    %25 = vector.broadcast %cst_19 : f32 to vector<64x128xf32>
    %26 = arith.mulf %25, %24 : vector<64x128xf32>
    %c0_20 = arith.constant 0 : index
    %c0_21 = arith.constant 0 : index
    %27 = vector.load %arg8[%c0_20, %c0_21] : memref<256x128xf32, #tpu.memory_space<vmem>>, vector<64x128xf32>
    tpu.vector_store %arg8[%c0_20, %c0_21], %26 {strides = array<i32>} : memref<256x128xf32, #tpu.memory_space<vmem>>, vector<64x128xf32>,
    %c64 = arith.constant 64 : index
    %c0_22 = arith.constant 0 : index
    %28 = vector.load %arg1[%c64, %c0_22] : memref<256x32xf32, #tpu.memory_space<vmem>>, vector<64x32xf32>
    %cst_23 = arith.constant dense<0.000000e+00> : vector<64x128xf32>
    %29 = tpu.matmul %28, %0, %cst_23 {dimension_numbers = #tpu.dot_dimension_numbers<[1], [0], [0], [1], [0, 0, 1, 1], [], []>} : vector<64x32xf32>, vector<32x128xf32>, vector<64x128xf32> -> vector<64x128xf32>
    %30 = vector.broadcast %1 : vector<1x128xf32> to vector<64x128xf32>
    %31 = arith.addf %29, %30 : vector<64x128xf32>
    %cst_24 = arith.constant 0.000000e+00 : f32
    %32 = vector.broadcast %cst_24 : f32 to vector<64x128xf32>
    %33 = arith.maximumf %31, %32 : vector<64x128xf32>
    %cst_25 = arith.constant dense<0.000000e+00> : vector<64x128xf32>
    %34 = tpu.matmul %33, %2, %cst_25 {dimension_numbers = #tpu.dot_dimension_numbers<[1], [0], [0], [1], [0, 0, 1, 1], [], []>} : vector<64x128xf32>, vector<128x128xf32>, vector<64x128xf32> -> vector<64x128xf32>
    %35 = vector.broadcast %3 : vector<1x128xf32> to vector<64x128xf32>
    %36 = arith.addf %34, %35 : vector<64x128xf32>
    %cst_26 = arith.constant 0.000000e+00 : f32
    %37 = vector.broadcast %cst_26 : f32 to vector<64x128xf32>
    %38 = arith.maximumf %36, %37 : vector<64x128xf32>
    %cst_27 = arith.constant dense<0.000000e+00> : vector<64x128xf32>
    %39 = tpu.matmul %38, %4, %cst_27 {dimension_numbers = #tpu.dot_dimension_numbers<[1], [0], [0], [1], [0, 0, 1, 1], [], []>} : vector<64x128xf32>, vector<128x128xf32>, vector<64x128xf32> -> vector<64x128xf32>
    %40 = vector.broadcast %5 : vector<1x128xf32> to vector<64x128xf32>
    %41 = arith.addf %39, %40 : vector<64x128xf32>
    %cst_28 = arith.constant 5.000000e-01 : f32
    %42 = vector.broadcast %cst_28 : f32 to vector<64x128xf32>
    %43 = arith.mulf %42, %41 : vector<64x128xf32>
    %44 = math.tanh %43 : vector<64x128xf32>
    %cst_29 = arith.constant 1.000000e+00 : f32
    %45 = vector.broadcast %cst_29 : f32 to vector<64x128xf32>
    %46 = arith.addf %44, %45 : vector<64x128xf32>
    %cst_30 = arith.constant 5.000000e-01 : f32
    %47 = vector.broadcast %cst_30 : f32 to vector<64x128xf32>
    %48 = arith.mulf %47, %46 : vector<64x128xf32>
    %c64_31 = arith.constant 64 : index
    %c0_32 = arith.constant 0 : index
    %49 = vector.load %arg8[%c64_31, %c0_32] : memref<256x128xf32, #tpu.memory_space<vmem>>, vector<64x128xf32>
    tpu.vector_store %arg8[%c64_31, %c0_32], %48 {strides = array<i32>} : memref<256x128xf32, #tpu.memory_space<vmem>>, vector<64x128xf32>,
    %c128 = arith.constant 128 : index
    %c0_33 = arith.constant 0 : index
    %50 = vector.load %arg1[%c128, %c0_33] : memref<256x32xf32, #tpu.memory_space<vmem>>, vector<64x32xf32>
    %cst_34 = arith.constant dense<0.000000e+00> : vector<64x128xf32>
    %51 = tpu.matmul %50, %0, %cst_34 {dimension_numbers = #tpu.dot_dimension_numbers<[1], [0], [0], [1], [0, 0, 1, 1], [], []>} : vector<64x32xf32>, vector<32x128xf32>, vector<64x128xf32> -> vector<64x128xf32>
    %52 = vector.broadcast %1 : vector<1x128xf32> to vector<64x128xf32>
    %53 = arith.addf %51, %52 : vector<64x128xf32>
    %cst_35 = arith.constant 0.000000e+00 : f32
    %54 = vector.broadcast %cst_35 : f32 to vector<64x128xf32>
    %55 = arith.maximumf %53, %54 : vector<64x128xf32>
    %cst_36 = arith.constant dense<0.000000e+00> : vector<64x128xf32>
    %56 = tpu.matmul %55, %2, %cst_36 {dimension_numbers = #tpu.dot_dimension_numbers<[1], [0], [0], [1], [0, 0, 1, 1], [], []>} : vector<64x128xf32>, vector<128x128xf32>, vector<64x128xf32> -> vector<64x128xf32>
    %57 = vector.broadcast %3 : vector<1x128xf32> to vector<64x128xf32>
    %58 = arith.addf %56, %57 : vector<64x128xf32>
    %cst_37 = arith.constant 0.000000e+00 : f32
    %59 = vector.broadcast %cst_37 : f32 to vector<64x128xf32>
    %60 = arith.maximumf %58, %59 : vector<64x128xf32>
    %cst_38 = arith.constant dense<0.000000e+00> : vector<64x128xf32>
    %61 = tpu.matmul %60, %4, %cst_38 {dimension_numbers = #tpu.dot_dimension_numbers<[1], [0], [0], [1], [0, 0, 1, 1], [], []>} : vector<64x128xf32>, vector<128x128xf32>, vector<64x128xf32> -> vector<64x128xf32>
    %62 = vector.broadcast %5 : vector<1x128xf32> to vector<64x128xf32>
    %63 = arith.addf %61, %62 : vector<64x128xf32>
    %cst_39 = arith.constant 5.000000e-01 : f32
    %64 = vector.broadcast %cst_39 : f32 to vector<64x128xf32>
    %65 = arith.mulf %64, %63 : vector<64x128xf32>
    %66 = math.tanh %65 : vector<64x128xf32>
    %cst_40 = arith.constant 1.000000e+00 : f32
    %67 = vector.broadcast %cst_40 : f32 to vector<64x128xf32>
    %68 = arith.addf %66, %67 : vector<64x128xf32>
    %cst_41 = arith.constant 5.000000e-01 : f32
    %69 = vector.broadcast %cst_41 : f32 to vector<64x128xf32>
    %70 = arith.mulf %69, %68 : vector<64x128xf32>
    %c128_42 = arith.constant 128 : index
    %c0_43 = arith.constant 0 : index
    %71 = vector.load %arg8[%c128_42, %c0_43] : memref<256x128xf32, #tpu.memory_space<vmem>>, vector<64x128xf32>
    tpu.vector_store %arg8[%c128_42, %c0_43], %70 {strides = array<i32>} : memref<256x128xf32, #tpu.memory_space<vmem>>, vector<64x128xf32>,
    %c192 = arith.constant 192 : index
    %c0_44 = arith.constant 0 : index
    %72 = vector.load %arg1[%c192, %c0_44] : memref<256x32xf32, #tpu.memory_space<vmem>>, vector<64x32xf32>
    %cst_45 = arith.constant dense<0.000000e+00> : vector<64x128xf32>
    %73 = tpu.matmul %72, %0, %cst_45 {dimension_numbers = #tpu.dot_dimension_numbers<[1], [0], [0], [1], [0, 0, 1, 1], [], []>} : vector<64x32xf32>, vector<32x128xf32>, vector<64x128xf32> -> vector<64x128xf32>
    %74 = vector.broadcast %1 : vector<1x128xf32> to vector<64x128xf32>
    %75 = arith.addf %73, %74 : vector<64x128xf32>
    %cst_46 = arith.constant 0.000000e+00 : f32
    %76 = vector.broadcast %cst_46 : f32 to vector<64x128xf32>
    %77 = arith.maximumf %75, %76 : vector<64x128xf32>
    %cst_47 = arith.constant dense<0.000000e+00> : vector<64x128xf32>
    %78 = tpu.matmul %77, %2, %cst_47 {dimension_numbers = #tpu.dot_dimension_numbers<[1], [0], [0], [1], [0, 0, 1, 1], [], []>} : vector<64x128xf32>, vector<128x128xf32>, vector<64x128xf32> -> vector<64x128xf32>
    %79 = vector.broadcast %3 : vector<1x128xf32> to vector<64x128xf32>
    %80 = arith.addf %78, %79 : vector<64x128xf32>
    %cst_48 = arith.constant 0.000000e+00 : f32
    %81 = vector.broadcast %cst_48 : f32 to vector<64x128xf32>
    %82 = arith.maximumf %80, %81 : vector<64x128xf32>
    %cst_49 = arith.constant dense<0.000000e+00> : vector<64x128xf32>
    %83 = tpu.matmul %82, %4, %cst_49 {dimension_numbers = #tpu.dot_dimension_numbers<[1], [0], [0], [1], [0, 0, 1, 1], [], []>} : vector<64x128xf32>, vector<128x128xf32>, vector<64x128xf32> -> vector<64x128xf32>
    %84 = vector.broadcast %5 : vector<1x128xf32> to vector<64x128xf32>
    %85 = arith.addf %83, %84 : vector<64x128xf32>
    %cst_50 = arith.constant 5.000000e-01 : f32
    %86 = vector.broadcast %cst_50 : f32 to vector<64x128xf32>
    %87 = arith.mulf %86, %85 : vector<64x128xf32>
    %88 = math.tanh %87 : vector<64x128xf32>
    %cst_51 = arith.constant 1.000000e+00 : f32
    %89 = vector.broadcast %cst_51 : f32 to vector<64x128xf32>
    %90 = arith.addf %88, %89 : vector<64x128xf32>
    %cst_52 = arith.constant 5.000000e-01 : f32
    %91 = vector.broadcast %cst_52 : f32 to vector<64x128xf32>
    %92 = arith.mulf %91, %90 : vector<64x128xf32>
    %c192_53 = arith.constant 192 : index
    %c0_54 = arith.constant 0 : index
    %93 = vector.load %arg8[%c192_53, %c0_54] : memref<256x128xf32, #tpu.memory_space<vmem>>, vector<64x128xf32>
    tpu.vector_store %arg8[%c192_53, %c0_54], %92 {strides = array<i32>} : memref<256x128xf32, #tpu.memory_space<vmem>>, vector<64x128xf32>,
    return
  }
  func.func @transform_0(%arg0: i32) -> (i32, i32) {
    %c0_i32 = arith.constant 0 : i32
    %c0_i32_0 = arith.constant 0 : i32
    return %arg0, %c0_i32 : i32, i32
  }
  func.func @transform_1(%arg0: i32) -> (i32, i32) {
    %c0_i32 = arith.constant 0 : i32
    %c0_i32_0 = arith.constant 0 : i32
    %c0_i32_1 = arith.constant 0 : i32
    return %c0_i32, %c0_i32_0 : i32, i32
  }
  func.func @transform_2(%arg0: i32) -> (i32, i32) {
    %c0_i32 = arith.constant 0 : i32
    %c0_i32_0 = arith.constant 0 : i32
    %c0_i32_1 = arith.constant 0 : i32
    return %c0_i32, %c0_i32_0 : i32, i32
  }
  func.func @transform_3(%arg0: i32) -> (i32, i32) {
    %c0_i32 = arith.constant 0 : i32
    %c0_i32_0 = arith.constant 0 : i32
    %c0_i32_1 = arith.constant 0 : i32
    return %c0_i32, %c0_i32_0 : i32, i32
  }
  func.func @transform_4(%arg0: i32) -> (i32, i32) {
    %c0_i32 = arith.constant 0 : i32
    %c0_i32_0 = arith.constant 0 : i32
    %c0_i32_1 = arith.constant 0 : i32
    return %c0_i32, %c0_i32_0 : i32, i32
  }
  func.func @transform_5(%arg0: i32) -> (i32, i32) {
    %c0_i32 = arith.constant 0 : i32
    %c0_i32_0 = arith.constant 0 : i32
    %c0_i32_1 = arith.constant 0 : i32
    return %c0_i32, %c0_i32_0 : i32, i32
  }
  func.func @transform_6(%arg0: i32) -> (i32, i32) {
    %c0_i32 = arith.constant 0 : i32
    %c0_i32_0 = arith.constant 0 : i32
    %c0_i32_1 = arith.constant 0 : i32
    return %c0_i32, %c0_i32_0 : i32, i32
  }
  func.func @transform_7(%arg0: i32) -> (i32, i32) {
    %c0_i32 = arith.constant 0 : i32
    %c0_i32_0 = arith.constant 0 : i32
    return %arg0, %c0_i32 : i32, i32
  }
}

</mosaic_0001>

<bundles_post_ra>
// kernel: tpu_custom_call.1
= control target key start
LH: loop header
LB: loop body
LE: loop exit
PB: predicated region body
PF: predicated region fallthrough
CT: control target
= control target key end

     0   :  { %12 = vsyncpa [#allocation3], 0  ;;  %s3853_s0 = inlined_call_operand.vmem [shape: f32[1024,32], index: 0, kind: input, shape index: {}]   ;;  %s3854_s1 = inlined_call_operand.vmem [shape: f32[32,128], index: 1, kind: input, shape index: {}]   ;;  %s3855_s2 = inlined_call_operand.vmem [shape: f32[1,128], index: 2, kind: input, shape index: {}]   ;;  %s3856_s3 = inlined_call_operand.vmem [shape: f32[128,128], index: 3, kind: input, shape index: {}]   ;;  %s3857_s4 = inlined_call_operand.vmem [shape: f32[1,128], index: 4, kind: input, shape index: {}]   ;;  %s3858_s5 = inlined_call_operand.vmem [shape: f32[128,128], index: 5, kind: input, shape index: {}]   ;;  %s3859_s6 = inlined_call_operand.vmem [shape: f32[1,128], index: 6, kind: input, shape index: {}]   ;;  %s3860_s7 = inlined_call_operand.hbm [shape: f32[1024,128], index: 7, kind: output, shape index: {}]  }
   0x1   :  { %14 = vsyncpa [#allocation3 + $0x1], 0  ;;  %s3248_s24 = smov 0   ;;  %s3250_s25 = smov 0  }
   0x2   :  { %s3252_s26 = smov 0   ;;  %s3254_s27 = smov 0  }
   0x3 LB: > { %s3269_s28 = sadd.s32 4294967295, %s3203_s27   ;;  %s2026_s29 = sadd.s32 4294967294, %s3203_s27   ;;  %s3203_s27 = sphi %s3254_s27, %s3866_s27   ;;  %s3199_s26 = sphi %s3252_s26, %s3865_s26   ;;  %s3195_s25 = sphi %s3250_s25, %s3864_s25   ;;  %s3191_s24 = sphi %s3248_s24, %s3863_s24  }
   0x4   : > { %s3273_s30 = sadd.s32 1, %s3203_s27   ;;  %s179_s8 = sadd.s32 1, %s3199_s26 }
   0x5   : > { %s176_s9 = ssub.s32 %s3203_s27, %s3273_s30  ;;  %p189_p0 = scmp.ne.s32.totalorder %s3199_s26, %s3195_s25 }
   0x6   : > { %p177_p1 = scmp.eq.s32.totalorder %s176_s9, 0  ;;  %p190_p2 = scmp.eq.s32.totalorder %s3269_s28, 3 }
   0x7   : > { %p195_p3 = scmp.ne.s32.totalorder %s3195_s25, %s3191_s24  ;;  %p196_p4 = scmp.eq.s32.totalorder %s2026_s29, 3 }
   0x8   : > { %s3284_s10 = scalar_select %p177_p1, %s3199_s26, %s179_s8  }
   0x9   : > { %p3286_p5 = por %p190_p2, %p189_p0  ;;  %p3290_p6 = por %p196_p4, %p195_p3 }
   0xa   : > { %p2029_p7 = scmp.ge.s32.totalorder %s3203_s27, 1  ;;  %p241_p8 = scmp.lt.s32.totalorder %s3203_s27, 5 }
   0xc   : > { %p242_p9 = pnand %p2029_p7, %p241_p8 }
   0xd   : > { %v280_v0 = vld [vmem:[%s3854_s1] sm:$0xff] (!%p242_p9)  ;;  %v281_v1 = vld [vmem:[%s3854_s1 + $0x8] sm:$0xff] (!%p242_p9)  ;;  %v282_v2 = vld [vmem:[%s3854_s1 + $0x10] sm:$0xff] (!%p242_p9)  ;;  %s2031_s19 = sshll.u32 (!%p242_p9), %s3269_s28, 5  ;;  %vm333_vm0 = vcmask (!%p242_p9), 261120   ;;  %s270_s16 = sand.u32 (!%p242_p9), 1, %s3195_s25  }
   0xe   : > { %245 = sbr.rel (%p242_p9) target bundleno = 1471 (0x5bf), region = 48  ;;  %v3306_v3 = vpack.c.bf16 (!%p242_p9), %v281_v1, %v280_v0  ;;  %v283_v4 = vld [vmem:[%s3854_s1 + $0x18] sm:$0xff] (!%p242_p9)  ;;  %p274_p10 = scmp.lt.s32.totalorder (!%p242_p9), %s2031_s19, 127  ;;  %v285_v5 = vld [vmem:[%s3856_s3] sm:$0xff] (!%p242_p9)  ;;  %v286_v6 = vld [vmem:[%s3856_s3 + $0x8] sm:$0xff] (!%p242_p9) }
   0xf   : > { %v3317_v7 = vpack.c.bf16 (!%p242_p9), %v283_v4, %v282_v2  ;;  %v3319_v8 = vpack.c.bf16 (!%p242_p9), %v286_v6, %v285_v5  ;;  %v287_v9 = vld [vmem:[%s3856_s3 + $0x10] sm:$0xff] (!%p242_p9)  ;;  %v288_v10 = vld [vmem:[%s3856_s3 + $0x18] sm:$0xff] (!%p242_p9)  ;;  %v289_v12 = vld [vmem:[%s3856_s3 + $0x20] sm:$0xff] (!%p242_p9)  ;;  %s2030_s17 = sshll.u32 (!%p242_p9), %s270_s16, 8  ;;  %s2073_s23 = sshll.u32 (!%p242_p9), %s3269_s28, 12 }
  0x10   : > { %2747 = vmatprep.subr.bf16.mxu0 (!%p242_p9), %v3306_v3  ;;  %v3328_v11 = vpack.c.bf16 (!%p242_p9), %v288_v10, %v287_v9  ;;  %v290_v13 = vld [vmem:[%s3856_s3 + $0x28] sm:$0xff] (!%p242_p9)  ;;  %v291_v16 = vld [vmem:[%s3856_s3 + $0x30] sm:$0xff] (!%p242_p9)  ;;  %v292_v17 = vld [vmem:[%s3856_s3 + $0x38] sm:$0xff] (!%p242_p9)  ;;  %s3638_s18 = scalar_lea.vmem (!%p242_p9), [#allocation2], %s2030_s17  ;;  %s3804_s13 = scalar_lea.hbm (!%p242_p9), %s3860_s7, %s2073_s23 }
  0x11   : > { %2749 = vmatpush3.bf16.msra.mxu0 (!%p242_p9), %v3306_v3  ;;  %2755 = vmatprep.subr.bf16.mxu1 (!%p242_p9), %v3319_v8  ;;  %v3346_v14 = vpack.c.bf16 (!%p242_p9), %v290_v13, %v289_v12  ;;  %v3361_v20 = vpack.c.bf16 (!%p242_p9), %v292_v17, %v291_v16  ;;  %v293_v21 = vld [vmem:[%s3856_s3 + $0x40] sm:$0xff] (!%p242_p9)  ;;  %v294_v22 = vld [vmem:[%s3856_s3 + $0x48] sm:$0xff] (!%p242_p9)  ;;  %v295_v26 = vld [vmem:[%s3856_s3 + $0x50] sm:$0xff] (!%p242_p9)  ;;  %s1964_s8 = sshll.u32 (!%p242_p9), %s3638_s18, 4  ;;  %s3812_s28 = scalar_lea.sflag (!%p242_p9), [#allocation3], %s270_s16  ;;  %s3806_s8 = int_to_ptr.vmem [resolvable:$true] %s1964_s8 }
  0x12   : > { %2751 = vmatprep.subr.bf16.mxu0 (!%p242_p9), %v3317_v7  ;;  %2757 = vmatpush3.bf16.msra.mxu1 (!%p242_p9), %v3319_v8  ;;  %v3375_v25 = vpack.c.bf16 (!%p242_p9), %v294_v22, %v293_v21  ;;  %v296_v27 = vld [vmem:[%s3856_s3 + $0x58] sm:$0xff] (!%p242_p9)  ;;  %v297_v31 = vld [vmem:[%s3856_s3 + $0x60] sm:$0xff] (!%p242_p9)  ;;  %v298_v32 = vld [vmem:[%s3856_s3 + $0x68] sm:$0xff] (!%p242_p9)  ;;  %s3141_s14 = scalar_lea.vmem (!%p242_p9), %s3806_s8, 4096  ;;  %s3205_s15 = smov (!%p242_p9), [#allocation2]  }
  0x13   : > { %2759 = vmatprep.subr.bf16.mxu1 (!%p242_p9), %v3328_v11  ;;  %v3389_v30 = vpack.c.bf16 (!%p242_p9), %v296_v27, %v295_v26  ;;  %v3402_v34 = vpack.c.bf16 (!%p242_p9), %v298_v32, %v297_v31  ;;  %v299_v35 = vld [vmem:[%s3856_s3 + $0x70] sm:$0xff] (!%p242_p9)  ;;  %v300_v36 = vld [vmem:[%s3856_s3 + $0x78] sm:$0xff] (!%p242_p9)  ;;  %v302_v38 = vld [vmem:[%s3858_s5] sm:$0xff] (!%p242_p9)  ;;  %p3142_p11 = scmp.ne.s32.totalorder (!%p242_p9), %s3806_s8, %s3141_s14  ;;  %s3145_s17 = sshll.u32 (!%p242_p9), %s3205_s15, 4  ;;  %s3146_s17 = int_to_ptr.vmem [resolvable:$false] %s3145_s17 }
  0x14   : > { %v3414_v37 = vpack.c.bf16 (!%p242_p9), %v300_v36, %v299_v35  ;;  %v303_v39 = vld [vmem:[%s3858_s5 + $0x8] sm:$0xff] (!%p242_p9)  ;;  %v304_v40 = vld [vmem:[%s3858_s5 + $0x10] sm:$0xff] (!%p242_p9)  ;;  %v305_v42 = vld [vmem:[%s3858_s5 + $0x18] sm:$0xff] (!%p242_p9)  ;;  %p3148_p0 = scmp.lt.s32.totalorder (!%p242_p9), %s3806_s8, %s3146_s17 }
  0x15   : > { %s3868_s19 = smov (!%p274_p10, %s2031_s19), 127  ;;  %2753 = vmatpush3.bf16.msra.mxu0 %v3317_v7  ;;  %v3428_v41 = vpack.c.bf16 %v303_v39, %v302_v38  ;;  %v3433_v43 = vpack.c.bf16 %v305_v42, %v304_v40  ;;  %v306_v44 = vld [vmem:[%s3858_s5 + $0x20] sm:$0xff]  ;;  %v307_v45 = vld [vmem:[%s3858_s5 + $0x28] sm:$0xff]  ;;  %v308_v47 = vld [vmem:[%s3858_s5 + $0x30] sm:$0xff]  ;;  %p3143_p12 = pnand %p3142_p11, %p3286_p5 }
  0x16   : > { %s2032_s21 = sshll.u32 %s3868_s19, 3  ;;  %2761 = vmatpush3.bf16.msra.mxu1 %v3328_v11  ;;  %v3444_v46 = vpack.c.bf16 %v307_v45, %v306_v44  ;;  %v309_v48 = vld [vmem:[%s3858_s5 + $0x38] sm:$0xff]  ;;  %v310_v50 = vld [vmem:[%s3858_s5 + $0x40] sm:$0xff]  ;;  %v311_v51 = vld [vmem:[%s3858_s5 + $0x48] sm:$0xff] }
  0x17   : > { %s3343_s29 = scalar_lea.vmem %s3853_s0, %s2032_s21  ;;  %2763 = vmatprep.subr.bf16.mxu1 %v3346_v14  ;;  %2787 = vmatprep.subr.bf16.mxu0 %v3428_v41  ;;  %v3454_v49 = vpack.c.bf16 %v309_v48, %v308_v47  ;;  %v3464_v52 = vpack.c.bf16 %v311_v51, %v310_v50  ;;  %v312_v53 = vld [vmem:[%s3858_s5 + $0x50] sm:$0xff]  ;;  %v313_v54 = vld [vmem:[%s3858_s5 + $0x58] sm:$0xff]  ;;  %v314_v56 = vld [vmem:[%s3858_s5 + $0x60] sm:$0xff]  ;;  %p3144_p13 = pneg %p3143_p12 }
  0x18   : > { %v319_v15 = vld [vmem:[%s3343_s29] sm:$0xff]  ;;  %v320_v18 = vld [vmem:[%s3343_s29 + $0x8] sm:$0xff]  ;;  %v321_v19 = vld [vmem:[%s3343_s29 + $0x10] sm:$0xff]  ;;  %v3474_v55 = vpack.c.bf16 %v313_v54, %v312_v53 }
  0x19   : > { %2322 = vmatprep.mubr.msk.f32.mxu0 %vm333_vm0, %v319_v15  ;;  %v322_v23 = vld [vmem:[%s3343_s29 + $0x18] sm:$0xff]  ;;  %v323_v24 = vld [vmem:[%s3343_s29 + $0x20] sm:$0xff]  ;;  %v324_v28 = vld [vmem:[%s3343_s29 + $0x28] sm:$0xff] }
  0x1a   : > { %2323 = vmatmul.mubr.msk.f32.vlgmr.msra.gmra.mrb[0].mxu0 %vm333_vm0, %v320_v18  ;;  %2765 = vmatpush3.bf16.msra.mxu1 %v3346_v14  ;;  %v325_v29 = vld [vmem:[%s3343_s29 + $0x30] sm:$0xff]  ;;  %v326_v33 = vld [vmem:[%s3343_s29 + $0x38] sm:$0xff]  ;;  %v315_v57 = vld [vmem:[%s3858_s5 + $0x68] sm:$0xff] }
  0x1b   : > { %2325 = vmatprep.mubr.msk.f32.mxu0 %vm333_vm0, %v321_v19  ;;  %2767 = vmatprep.subr.bf16.mxu1 %v3361_v20  ;;  %v3484_v58 = vpack.c.bf16 %v315_v57, %v314_v56  ;;  %v3492_v59 = vld [vmem:[%s3855_s2] ss:$0 sm:$0xff]  ;;  %v744_v31 = vld [vmem:[%s3343_s29 + $0x58] sm:$0xff]  ;;  %v747_v35 = vld [vmem:[%s3343_s29 + $0x70] sm:$0xff] }
  0x1c   : > { %2789 = vmatpush3.bf16.msra.mxu0 %v3428_v41  ;;  %v741_v27 = vld [vmem:[%s3343_s29 + $0x40] sm:$0xff]  ;;  %v748_v36 = vld [vmem:[%s3343_s29 + $0x78] sm:$0xff]  ;;  %v316_v38 = vld [vmem:[%s3858_s5 + $0x70] sm:$0xff] }
  0x1d   : > { %2791 = vmatprep.subr.bf16.mxu0 %v3433_v43  ;;  %v745_v32 = vld [vmem:[%s3343_s29 + $0x60] sm:$0xff]  ;;  %v317_v39 = vld [vmem:[%s3858_s5 + $0x78] sm:$0xff] }
  0x1e   : > { %2326 = vmatmul.mubr.msk.f32.gmra.mrb[2].mxu0 %vm333_vm0, %v322_v23  ;;  %2769 = vmatpush3.bf16.msra.mxu1 %v3361_v20  ;;  %v3541_v40 = vpack.c.bf16 %v317_v39, %v316_v38  ;;  %v3552_v42 = vld [vmem:[%s3857_s4] ss:$0 sm:$0xff] }
  0x1f   : > { %2328 = vmatprep.mubr.msk.f32.mxu0 %vm333_vm0, %v323_v24  ;;  %2771 = vmatprep.subr.bf16.mxu1 %v3375_v25 }
  0x20   : > { %2793 = vmatpush3.bf16.msra.mxu0 %v3433_v43 }
  0x21   : > { %2795 = vmatprep.subr.bf16.mxu0 %v3444_v46 }
  0x22   : > { %2329 = vmatmul.mubr.msk.f32.gmra.mrb[4].mxu0 %vm333_vm0, %v324_v28  ;;  %2773 = vmatpush3.bf16.msra.mxu1 %v3375_v25  ;;  %v742_v28 = vld [vmem:[%s3343_s29 + $0x48] sm:$0xff] }
  0x23   : > { %2331 = vmatprep.mubr.msk.f32.mxu0 %vm333_vm0, %v325_v29  ;;  %2775 = vmatprep.subr.bf16.mxu1 %v3389_v30  ;;  %v743_v29 = vld [vmem:[%s3343_s29 + $0x50] sm:$0xff] }
  0x24   : > { %2797 = vmatpush3.bf16.msra.mxu0 %v3444_v46 }
  0x25   : > { %2799 = vmatprep.subr.bf16.mxu0 %v3454_v49 }
  0x26   : > { %2332 = vmatmul.mubr.msk.f32.gmra.mrb[6].mxu0 %vm333_vm0, %v326_v33  ;;  %2777 = vmatpush3.bf16.msra.mxu1 %v3389_v30  ;;  %v746_v33 = vld [vmem:[%s3343_s29 + $0x68] sm:$0xff] }
  0x27   : > { %2779 = vmatprep.subr.bf16.mxu1 %v3402_v34 }
  0x28   : > { %2801 = vmatpush3.bf16.msra.mxu0 %v3454_v49 }
  0x29   : > { %2803 = vmatprep.subr.bf16.mxu0 %v3464_v52 }
  0x2a   : > { %2781 = vmatpush3.bf16.msra.mxu1 %v3402_v34 }
  0x2b   : > { %2783 = vmatprep.subr.bf16.mxu1 %v3414_v37 }
  0x2c   : > { %2805 = vmatpush3.bf16.msra.mxu0 %v3464_v52 }
  0x2d   : > { %2807 = vmatprep.subr.bf16.mxu0 %v3474_v55 }
  0x2e   : > { %2785 = vmatpush3.bf16.msra.mxu1 %v3414_v37 }
  0x2f   : > { %2819 = vmatprep.subr.bf16.mxu1 %v3306_v3 }
  0x30   : > { %2809 = vmatpush3.bf16.msra.mxu0 %v3474_v55 }
  0x31   : > { %2811 = vmatprep.subr.bf16.mxu0 %v3484_v58 }
  0x34   : > { %2813 = vmatpush3.bf16.msra.mxu0 %v3484_v58 }
  0x35   : > { %2815 = vmatprep.subr.bf16.mxu0 %v3541_v40 }
  0x38   : > { %2817 = vmatpush3.bf16.msra.mxu0 %v3541_v40 }
  0x39   : > { %2827 = vmatprep.subr.bf16.mxu0 %v3319_v8 }
  0xed   : > { %v2324_v60 = vpop.f32.mrb[0].mxu0 }
  0xee   : > { %v430_v61 = vadd.f32 %v2324_v60, %v3492_v59  ;;  %v424_v62 = vpop.f32.mrb[1].mxu0 }
  0xef   : > { %v425_v63 = vadd.f32 %v3492_v59, %v424_v62 }
  0xf0   : > { %v464_v2 = vmax.f32 %v430_v61, 0.0 }
  0xf1   : > { %v463_v0 = vmax.f32 %v425_v63, 0.0  ;;  %v2327_v1 = vpop.f32.mrb[2].mxu0 }
  0xf2   : > { %v440_v4 = vadd.f32 %v2327_v1, %v3492_v59  ;;  %v434_v5 = vpop.f32.mrb[3].mxu0 }
  0xf3   : > { %2366 = vmatprep.mubr.f32.mxu1 %v463_v0  ;;  %v435_v6 = vadd.f32 %v3492_v59, %v434_v5 }
  0xf4   : > { %2367 = vmatmul.mubr.f32.vlgmr.msra.gmra.mrb[0].mxu1 %v464_v2  ;;  %v466_v9 = vmax.f32 %v440_v4, 0.0 }
  0xf5   : > { %v465_v10 = vmax.f32 %v435_v6, 0.0  ;;  %v2330_v12 = vpop.f32.mrb[4].mxu0  ;;  %2821 = vmatpush3.bf16.msra.mxu1 %v3306_v3 }
  0xf6   : > { %v450_v13 = vadd.f32 %v2330_v12, %v3492_v59  ;;  %v444_v15 = vpop.f32.mrb[5].mxu0  ;;  %2823 = vmatprep.subr.bf16.mxu1 %v3317_v7 }
  0xf7   : > { %v445_v16 = vadd.f32 %v3492_v59, %v444_v15  ;;  %2369 = vmatprep.mubr.f32.mxu1 %v465_v10 }
  0xf8   : > { %v468_v17 = vmax.f32 %v450_v13, 0.0  ;;  %2370 = vmatmul.mubr.f32.gmra.mrb[2].mxu1 %v466_v9 }
  0xf9   : > { %v467_v18 = vmax.f32 %v445_v16, 0.0  ;;  %v2333_v19 = vpop.f32.mrb[6].mxu0  ;;  %2825 = vmatpush3.bf16.msra.mxu1 %v3317_v7 }
  0xfa   : > { %v460_v21 = vadd.f32 %v2333_v19, %v3492_v59  ;;  %v454_v22 = vpop.f32.mrb[7].mxu0  ;;  %2859 = vmatprep.subr.bf16.mxu1 %v3428_v41 }
  0xfb   : > { %v455_v23 = vadd.f32 %v3492_v59, %v454_v22  ;;  %2372 = vmatprep.mubr.f32.mxu1 %v467_v18 }
  0xfc   : > { %v470_v24 = vmax.f32 %v460_v21, 0.0  ;;  %2373 = vmatmul.mubr.f32.gmra.mrb[4].mxu1 %v468_v17 }
  0xfd   : > { %v469_v26 = vmax.f32 %v455_v23, 0.0 }
  0xff   : > { %2375 = vmatprep.mubr.f32.mxu1 %v469_v26 }
 0x100   : > { %2376 = vmatmul.mubr.f32.gmra.mrb[6].mxu1 %v470_v24 }
 0x101   : > { %2430 = vmatprep.mubr.msk.f32.mxu1 %vm333_vm0, %v741_v27 }
 0x104   : > { %2431 = vmatmul.mubr.msk.f32.vlgmr.msra.gmra.mrb[8].mxu1 %vm333_vm0, %v742_v28 }
 0x105   : > { %2433 = vmatprep.mubr.msk.f32.mxu1 %vm333_vm0, %v743_v29  ;;  %2861 = vmatpush3.bf16.msra.mxu1 %v3428_v41 }
 0x106   : > { %2863 = vmatprep.subr.bf16.mxu1 %v3433_v43 }
 0x108   : > { %2434 = vmatmul.mubr.msk.f32.gmra.mrb[10].mxu1 %vm333_vm0, %v744_v31 }
 0x109   : > { %2436 = vmatprep.mubr.msk.f32.mxu1 %vm333_vm0, %v745_v32  ;;  %2865 = vmatpush3.bf16.msra.mxu1 %v3433_v43 }
 0x10a   : > { %2867 = vmatprep.subr.bf16.mxu1 %v3444_v46 }
 0x10c   : > { %2437 = vmatmul.mubr.msk.f32.gmra.mrb[12].mxu1 %vm333_vm0, %v746_v33 }
 0x10d   : > { %2439 = vmatprep.mubr.msk.f32.mxu1 %vm333_vm0, %v747_v35  ;;  %2869 = vmatpush3.bf16.msra.mxu1 %v3444_v46 }
 0x10e   : > { %2871 = vmatprep.subr.bf16.mxu1 %v3454_v49 }
 0x110   : > { %2440 = vmatmul.mubr.msk.f32.gmra.mrb[14].mxu1 %vm333_vm0, %v748_v36 }
 0x111   : > { %2873 = vmatpush3.bf16.msra.mxu1 %v3454_v49 }
 0x112   : > { %2875 = vmatprep.subr.bf16.mxu1 %v3464_v52 }
 0x115   : > { %2877 = vmatpush3.bf16.msra.mxu1 %v3464_v52 }
 0x116   : > { %2879 = vmatprep.subr.bf16.mxu1 %v3474_v55 }
 0x119   : > { %2881 = vmatpush3.bf16.msra.mxu1 %v3474_v55 }
 0x11a   : > { %2883 = vmatprep.subr.bf16.mxu1 %v3484_v58 }
 0x11d   : > { %2885 = vmatpush3.bf16.msra.mxu1 %v3484_v58 }
 0x11e   : > { %2887 = vmatprep.subr.bf16.mxu1 %v3541_v40 }
 0x121   : > { %2889 = vmatpush3.bf16.msra.mxu1 %v3541_v40 }
 0x122   : > { %2899 = vmatprep.subr.bf16.mxu1 %v3319_v8 }
 0x1c7   : > { %v2368_v44 = vpop.f32.mrb[0].mxu1 }
 0x1c8   : > { %v549_v45 = vadd.f32 %v2368_v44, %v3552_v42  ;;  %v543_v47 = vpop.f32.mrb[1].mxu1 }
 0x1c9   : > { %v544_v48 = vadd.f32 %v3552_v42, %v543_v47 }
 0x1ca   : > { %v583_v53 = vmax.f32 %v549_v45, 0.0 }
 0x1cb   : > { %v582_v50 = vmax.f32 %v544_v48, 0.0  ;;  %v2371_v51 = vpop.f32.mrb[2].mxu1 }
 0x1cc   : > { %v559_v54 = vadd.f32 %v2371_v51, %v3552_v42  ;;  %v553_v56 = vpop.f32.mrb[3].mxu1  ;;  %v1145_v51 = vld [vmem:[%s3343_s29 + $0x88] sm:$0xff] }
 0x1cd   : > { %2410 = vmatprep.mubr.f32.mxu0 %v582_v50  ;;  %v554_v57 = vadd.f32 %v3552_v42, %v553_v56  ;;  %v1144_v50 = vld [vmem:[%s3343_s29 + $0x80] sm:$0xff] }
 0x1ce   : > { %2411 = vmatmul.mubr.f32.vlgmr.msra.gmra.mrb[8].mxu0 %v583_v53  ;;  %v585_v60 = vmax.f32 %v559_v54, 0.0  ;;  %v1146_v53 = vld [vmem:[%s3343_s29 + $0x90] sm:$0xff]  ;;  %v1147_v54 = vld [vmem:[%s3343_s29 + $0x98] sm:$0xff]  ;;  %v1148_v56 = vld [vmem:[%s3343_s29 + $0xa0] sm:$0xff] }
 0x1cf   : > { %2829 = vmatpush3.bf16.msra.mxu0 %v3319_v8  ;;  %v584_v61 = vmax.f32 %v554_v57, 0.0  ;;  %v2374_v62 = vpop.f32.mrb[4].mxu1  ;;  %v1149_v57 = vld [vmem:[%s3343_s29 + $0xa8] sm:$0xff] }
 0x1d0   : > { %2831 = vmatprep.subr.bf16.mxu0 %v3328_v11  ;;  %v569_v63 = vadd.f32 %v2374_v62, %v3552_v42  ;;  %v563_v0 = vpop.f32.mrb[5].mxu1  ;;  %v3625_v62 = vld [vmem:[%s3859_s6] ss:$0 sm:$0xff] }
 0x1d1   : > { %v564_v1 = vadd.f32 %v3552_v42, %v563_v0  ;;  %2413 = vmatprep.mubr.f32.mxu0 %v584_v61  ;;  %v1151_v61 = vld [vmem:[%s3343_s29 + $0xb8] sm:$0xff] }
 0x1d2   : > { %v587_v2 = vmax.f32 %v569_v63, 0.0  ;;  %2414 = vmatmul.mubr.f32.gmra.mrb[10].mxu0 %v585_v60  ;;  %v1150_v60 = vld [vmem:[%s3343_s29 + $0xb0] sm:$0xff] }
 0x1d3   : > { %2833 = vmatpush3.bf16.msra.mxu0 %v3328_v11  ;;  %v586_v4 = vmax.f32 %v564_v1, 0.0  ;;  %v2377_v5 = vpop.f32.mrb[6].mxu1 }
 0x1d4   : > { %2835 = vmatprep.subr.bf16.mxu0 %v3346_v14  ;;  %v579_v6 = vadd.f32 %v2377_v5, %v3552_v42  ;;  %v573_v9 = vpop.f32.mrb[7].mxu1 }
 0x1d5   : > { %v574_v10 = vadd.f32 %v3552_v42, %v573_v9  ;;  %2416 = vmatprep.mubr.f32.mxu0 %v586_v4 }
 0x1d6   : > { %v589_v12 = vmax.f32 %v579_v6, 0.0  ;;  %2417 = vmatmul.mubr.f32.gmra.mrb[12].mxu0 %v587_v2 }
 0x1d7   : > { %2837 = vmatpush3.bf16.msra.mxu0 %v3346_v14  ;;  %v588_v13 = vmax.f32 %v574_v10, 0.0  ;;  %v2432_v15 = vpop.f32.mrb[8].mxu1 }
 0x1d8   : > { %2839 = vmatprep.subr.bf16.mxu0 %v3361_v20  ;;  %v839_v16 = vpop.f32.mrb[9].mxu1  ;;  %v845_v28 = vadd.f32 %v2432_v15, %v3492_v59 }
 0x1d9   : > { %2419 = vmatprep.mubr.f32.mxu0 %v588_v13  ;;  %v840_v17 = vadd.f32 %v3492_v59, %v839_v16 }
 0x1da   : > { %2420 = vmatmul.mubr.f32.gmra.mrb[14].mxu0 %v589_v12  ;;  %v879_v33 = vmax.f32 %v845_v28, 0.0 }
 0x1db   : > { %2841 = vmatpush3.bf16.msra.mxu0 %v3361_v20  ;;  %v878_v18 = vmax.f32 %v840_v17, 0.0  ;;  %v2435_v19 = vpop.f32.mrb[10].mxu1 }
 0x1dc   : > { %2843 = vmatprep.subr.bf16.mxu0 %v3375_v25  ;;  %v849_v21 = vpop.f32.mrb[11].mxu1  ;;  %v855_v29 = vadd.f32 %v2435_v19, %v3492_v59 }
 0x1dd   : > { %2474 = vmatprep.mubr.f32.mxu0 %v878_v18  ;;  %v850_v27 = vadd.f32 %v3492_v59, %v849_v21 }
 0x1de   : > { %v881_v35 = vmax.f32 %v855_v29, 0.0 }
 0x1df   : > { %2845 = vmatpush3.bf16.msra.mxu0 %v3375_v25  ;;  %v2438_v22 = vpop.f32.mrb[12].mxu1  ;;  %v880_v31 = vmax.f32 %v850_v27, 0.0 }
 0x1e0   : > { %2847 = vmatprep.subr.bf16.mxu0 %v3389_v30  ;;  %v859_v23 = vpop.f32.mrb[13].mxu1  ;;  %v865_v36 = vadd.f32 %v2438_v22, %v3492_v59 }
 0x1e1   : > { %v860_v32 = vadd.f32 %v3492_v59, %v859_v23 }
 0x1e2   : > { %v883_v44 = vmax.f32 %v865_v36, 0.0 }
 0x1e3   : > { %2849 = vmatpush3.bf16.msra.mxu0 %v3389_v30  ;;  %v2441_v24 = vpop.f32.mrb[14].mxu1  ;;  %v882_v38 = vmax.f32 %v860_v32, 0.0 }
 0x1e4   : > { %2851 = vmatprep.subr.bf16.mxu0 %v3402_v34  ;;  %v869_v26 = vpop.f32.mrb[15].mxu1  ;;  %v875_v45 = vadd.f32 %v2441_v24, %v3492_v59 }
 0x1e5   : > { %v870_v39 = vadd.f32 %v3492_v59, %v869_v26 }
 0x1e6   : > { %v885_v48 = vmax.f32 %v875_v45, 0.0 }
 0x1e7   : > { %2853 = vmatpush3.bf16.msra.mxu0 %v3402_v34  ;;  %v884_v47 = vmax.f32 %v870_v39, 0.0 }
 0x1e8   : > { %2855 = vmatprep.subr.bf16.mxu0 %v3414_v37 }
 0x1eb   : > { %2857 = vmatpush3.bf16.msra.mxu0 %v3414_v37 }
 0x1ec   : > { %2891 = vmatprep.subr.bf16.mxu0 %v3306_v3 }
 0x1ee   : > { %2475 = vmatmul.mubr.f32.vlgmr.msra.gmra.mrb[16].mxu0 %v879_v33 }
 0x1ef   : > { %2477 = vmatprep.mubr.f32.mxu0 %v880_v31  ;;  %2893 = vmatpush3.bf16.msra.mxu0 %v3306_v3 }
 0x1f0   : > { %2895 = vmatprep.subr.bf16.mxu0 %v3317_v7 }
 0x1f2   : > { %2478 = vmatmul.mubr.f32.gmra.mrb[18].mxu0 %v881_v35 }
 0x1f3   : > { %2480 = vmatprep.mubr.f32.mxu0 %v882_v38  ;;  %2897 = vmatpush3.bf16.msra.mxu0 %v3317_v7 }
 0x1f4   : > { %2931 = vmatprep.subr.bf16.mxu0 %v3428_v41 }
 0x1f6   : > { %2481 = vmatmul.mubr.f32.gmra.mrb[20].mxu0 %v883_v44 }
 0x1f7   : > { %2483 = vmatprep.mubr.f32.mxu0 %v884_v47 }
 0x1fa   : > { %2484 = vmatmul.mubr.f32.gmra.mrb[22].mxu0 %v885_v48 }
 0x1fb   : > { %2538 = vmatprep.mubr.msk.f32.mxu0 %vm333_vm0, %v1144_v50 }
 0x1fe   : > { %2539 = vmatmul.mubr.msk.f32.vlgmr.msra.gmra.mrb[24].mxu0 %vm333_vm0, %v1145_v51 }
 0x1ff   : > { %2541 = vmatprep.mubr.msk.f32.mxu0 %vm333_vm0, %v1146_v53  ;;  %2933 = vmatpush3.bf16.msra.mxu0 %v3428_v41 }
 0x200   : > { %2935 = vmatprep.subr.bf16.mxu0 %v3433_v43 }
 0x202   : > { %2542 = vmatmul.mubr.msk.f32.gmra.mrb[26].mxu0 %vm333_vm0, %v1147_v54 }
 0x203   : > { %2544 = vmatprep.mubr.msk.f32.mxu0 %vm333_vm0, %v1148_v56  ;;  %2937 = vmatpush3.bf16.msra.mxu0 %v3433_v43 }
 0x204   : > { %2939 = vmatprep.subr.bf16.mxu0 %v3444_v46 }
 0x206   : > { %2545 = vmatmul.mubr.msk.f32.gmra.mrb[28].mxu0 %vm333_vm0, %v1149_v57 }
 0x207   : > { %2547 = vmatprep.mubr.msk.f32.mxu0 %vm333_vm0, %v1150_v60  ;;  %2941 = vmatpush3.bf16.msra.mxu0 %v3444_v46 }
 0x208   : > { %2943 = vmatprep.subr.bf16.mxu0 %v3454_v49 }
 0x20a   : > { %2548 = vmatmul.mubr.msk.f32.gmra.mrb[30].mxu0 %vm333_vm0, %v1151_v61 }
 0x20b   : > { %2945 = vmatpush3.bf16.msra.mxu0 %v3454_v49 }
 0x20c   : > { %2947 = vmatprep.subr.bf16.mxu0 %v3464_v52 }
 0x20f   : > { %2949 = vmatpush3.bf16.msra.mxu0 %v3464_v52 }
 0x210   : > { %2951 = vmatprep.subr.bf16.mxu0 %v3474_v55 }
 0x213   : > { %2953 = vmatpush3.bf16.msra.mxu0 %v3474_v55 }
 0x214   : > { %2955 = vmatprep.subr.bf16.mxu0 %v3484_v58 }
 0x217   : > { %2957 = vmatpush3.bf16.msra.mxu0 %v3484_v58 }
 0x218   : > { %2959 = vmatprep.subr.bf16.mxu0 %v3541_v40 }
 0x21b   : > { %2961 = vmatpush3.bf16.msra.mxu0 %v3541_v40 }
 0x21c   : > { %2971 = vmatprep.subr.bf16.mxu0 %v3319_v8 }
 0x2a1   : > { %v2412_v63 = vpop.f32.mrb[8].mxu0 }
 0x2a2   : > { %v668_v0 = vadd.f32 %v2412_v63, %v3625_v62  ;;  %v662_v1 = vpop.f32.mrb[9].mxu0 }
 0x2a3   : > { %v663_v2 = vadd.f32 %v3625_v62, %v662_v1 }
 0x2a4   : > { %v702_v4 = vmul.f32 0.5, %v668_v0 }
 0x2a5   : > { %v701_v5 = vmul.f32 0.5, %v663_v2  ;;  %v2415_v6 = vpop.f32.mrb[10].mxu0 }
 0x2a6   : > { %3075 = vtanh.f32 %v702_v4  ;;  %v678_v9 = vadd.f32 %v2415_v6, %v3625_v62  ;;  %v672_v10 = vpop.f32.mrb[11].mxu0 }
 0x2a7   : > { %3077 = vtanh.f32 %v701_v5  ;;  %v673_v12 = vadd.f32 %v3625_v62, %v672_v10 }
 0x2a8   : > { %v704_v13 = vmul.f32 0.5, %v678_v9 }
 0x2a9   : > { %v703_v15 = vmul.f32 0.5, %v673_v12  ;;  %v2418_v16 = vpop.f32.mrb[12].mxu0 }
 0x2aa   : > { %3079 = vtanh.f32 %v704_v13  ;;  %v688_v17 = vadd.f32 %v2418_v16, %v3625_v62  ;;  %v682_v18 = vpop.f32.mrb[13].mxu0 }
 0x2ab   : > { %3081 = vtanh.f32 %v703_v15  ;;  %v683_v19 = vadd.f32 %v3625_v62, %v682_v18 }
 0x2ac   : > { %v706_v21 = vmul.f32 0.5, %v688_v17 }
 0x2ad   : > { %v705_v22 = vmul.f32 0.5, %v683_v19  ;;  %v2421_v23 = vpop.f32.mrb[14].mxu0 }
 0x2ae   : > { %3083 = vtanh.f32 %v706_v21  ;;  %v698_v24 = vadd.f32 %v2421_v23, %v3625_v62  ;;  %v692_v26 = vpop.f32.mrb[15].mxu0 }
 0x2af   : > { %3085 = vtanh.f32 %v705_v22  ;;  %v693_v27 = vadd.f32 %v3625_v62, %v692_v26 }
 0x2b0   : > { %v3076_v28 = vpop.eup %3075  ;;  %v708_v29 = vmul.f32 0.5, %v698_v24 }
 0x2b1   : > { %v3078_v31 = vpop.eup %3077  ;;  %v718_v32 = vadd.f32 1.0, %v3076_v28  ;;  %v707_v33 = vmul.f32 0.5, %v693_v27 }
 0x2b2   : > { %v717_v35 = vadd.f32 1.0, %v3078_v31  ;;  %3087 = vtanh.f32 %v708_v29 }
 0x2b3   : > { %v726_v36 = vmul.f32 0.5, %v718_v32  ;;  %3089 = vtanh.f32 %v707_v33 }
 0x2b4   : > { %v3080_v38 = vpop.eup %3079  ;;  %v725_v39 = vmul.f32 0.5, %v717_v35 }
 0x2b5   : > { %v3082_v44 = vpop.eup %3081  ;;  %734 = vst [vmem:[%s3638_s18 + $0x8] sm:$0xff] %v726_v36  ;;  %v720_v45 = vadd.f32 1.0, %v3080_v38 }
 0x2b6   : > { %733 = vst [vmem:[%s3638_s18] sm:$0xff] %v725_v39  ;;  %v719_v47 = vadd.f32 1.0, %v3082_v44 }
 0x2b7   : > { %v728_v48 = vmul.f32 0.5, %v720_v45 }
 0x2b8   : > { %v3084_v50 = vpop.eup %3083  ;;  %v727_v51 = vmul.f32 0.5, %v719_v47 }
 0x2b9   : > { %v3086_v53 = vpop.eup %3085  ;;  %736 = vst [vmem:[%s3638_s18 + $0x18] sm:$0xff] %v728_v48  ;;  %v722_v54 = vadd.f32 1.0, %v3084_v50 }
 0x2ba   : > { %735 = vst [vmem:[%s3638_s18 + $0x10] sm:$0xff] %v727_v51  ;;  %v721_v56 = vadd.f32 1.0, %v3086_v53 }
 0x2bb   : > { %v730_v57 = vmul.f32 0.5, %v722_v54 }
 0x2bc   : > { %v3088_v60 = vpop.eup %3087  ;;  %v729_v61 = vmul.f32 0.5, %v721_v56 }
 0x2bd   : > { %v3090_v63 = vpop.eup %3089  ;;  %738 = vst [vmem:[%s3638_s18 + $0x28] sm:$0xff] %v730_v57  ;;  %v724_v0 = vadd.f32 1.0, %v3088_v60 }
 0x2be   : > { %737 = vst [vmem:[%s3638_s18 + $0x20] sm:$0xff] %v729_v61  ;;  %v723_v1 = vadd.f32 1.0, %v3090_v63 }
 0x2bf   : > { %v732_v2 = vmul.f32 0.5, %v724_v0 }
 0x2c0   : > { %v731_v4 = vmul.f32 0.5, %v723_v1 }
 0x2c1   : > { %740 = vst [vmem:[%s3638_s18 + $0x38] sm:$0xff] %v732_v2  ;;  %v2476_v5 = vpop.f32.mrb[16].mxu0 }
 0x2c2   : > { %739 = vst [vmem:[%s3638_s18 + $0x30] sm:$0xff] %v731_v4  ;;  %v958_v6 = vadd.f32 %v2476_v5, %v3552_v42  ;;  %v952_v9 = vpop.f32.mrb[17].mxu0 }
 0x2c3   : > { %v953_v10 = vadd.f32 %v3552_v42, %v952_v9 }
 0x2c4   : > { %v992_v15 = vmax.f32 %v958_v6, 0.0 }
 0x2c5   : > { %v991_v12 = vmax.f32 %v953_v10, 0.0  ;;  %v2479_v13 = vpop.f32.mrb[18].mxu0 }
 0x2c6   : > { %v968_v16 = vadd.f32 %v2479_v13, %v3552_v42  ;;  %v962_v17 = vpop.f32.mrb[19].mxu0  ;;  %v1548_v13 = vld [vmem:[%s3343_s29 + $0xc8] sm:$0xff] }
 0x2c7   : > { %2518 = vmatprep.mubr.f32.mxu1 %v991_v12  ;;  %v963_v18 = vadd.f32 %v3552_v42, %v962_v17  ;;  %v1552_v17 = vld [vmem:[%s3343_s29 + $0xe8] sm:$0xff] }
 0x2c8   : > { %2519 = vmatmul.mubr.f32.vlgmr.msra.gmra.mrb[16].mxu1 %v992_v15  ;;  %v994_v19 = vmax.f32 %v968_v16, 0.0  ;;  %v1549_v15 = vld [vmem:[%s3343_s29 + $0xd0] sm:$0xff]  ;;  %v1550_v16 = vld [vmem:[%s3343_s29 + $0xd8] sm:$0xff] }
 0x2c9   : > { %2901 = vmatpush3.bf16.msra.mxu1 %v3319_v8  ;;  %v993_v21 = vmax.f32 %v963_v18, 0.0  ;;  %v2482_v22 = vpop.f32.mrb[20].mxu0  ;;  %v1553_v18 = vld [vmem:[%s3343_s29 + $0xf0] sm:$0xff] }
 0x2ca   : > { %2903 = vmatprep.subr.bf16.mxu1 %v3328_v11  ;;  %v978_v23 = vadd.f32 %v2482_v22, %v3552_v42  ;;  %v972_v24 = vpop.f32.mrb[21].mxu0 }
 0x2cb   : > { %v973_v26 = vadd.f32 %v3552_v42, %v972_v24  ;;  %2521 = vmatprep.mubr.f32.mxu1 %v993_v21 }
 0x2cc   : > { %v996_v27 = vmax.f32 %v978_v23, 0.0  ;;  %2522 = vmatmul.mubr.f32.gmra.mrb[18].mxu1 %v994_v19  ;;  %v1554_v19 = vld [vmem:[%s3343_s29 + $0xf8] sm:$0xff] }
 0x2cd   : > { %2905 = vmatpush3.bf16.msra.mxu1 %v3328_v11  ;;  %v995_v28 = vmax.f32 %v973_v26, 0.0  ;;  %v2485_v29 = vpop.f32.mrb[22].mxu0 }
 0x2ce   : > { %2907 = vmatprep.subr.bf16.mxu1 %v3346_v14  ;;  %v988_v31 = vadd.f32 %v2485_v29, %v3552_v42  ;;  %v982_v32 = vpop.f32.mrb[23].mxu0 }
 0x2cf   : > { %v983_v33 = vadd.f32 %v3552_v42, %v982_v32  ;;  %2524 = vmatprep.mubr.f32.mxu1 %v995_v28 }
 0x2d0   : > { %v998_v35 = vmax.f32 %v988_v31, 0.0  ;;  %2525 = vmatmul.mubr.f32.gmra.mrb[20].mxu1 %v996_v27 }
 0x2d1   : > { %2909 = vmatpush3.bf16.msra.mxu1 %v3346_v14  ;;  %v997_v36 = vmax.f32 %v983_v33, 0.0  ;;  %v2540_v38 = vpop.f32.mrb[24].mxu0 }
 0x2d2   : > { %2911 = vmatprep.subr.bf16.mxu1 %v3361_v20  ;;  %v1242_v39 = vpop.f32.mrb[25].mxu0  ;;  %v1248_v57 = vadd.f32 %v2540_v38, %v3492_v59 }
 0x2d3   : > { %2527 = vmatprep.mubr.f32.mxu1 %v997_v36  ;;  %v1243_v44 = vadd.f32 %v3492_v59, %v1242_v39 }
 0x2d4   : > { %2528 = vmatmul.mubr.f32.gmra.mrb[22].mxu1 %v998_v35  ;;  %v1282_v0 = vmax.f32 %v1248_v57, 0.0 }
 0x2d5   : > { %2913 = vmatpush3.bf16.msra.mxu1 %v3361_v20  ;;  %v1281_v45 = vmax.f32 %v1243_v44, 0.0  ;;  %v2543_v47 = vpop.f32.mrb[26].mxu0 }
 0x2d6   : > { %2915 = vmatprep.subr.bf16.mxu1 %v3375_v25  ;;  %v1252_v48 = vpop.f32.mrb[27].mxu0  ;;  %v1258_v60 = vadd.f32 %v2543_v47, %v3492_v59 }
 0x2d7   : > { %2582 = vmatprep.mubr.f32.mxu1 %v1281_v45  ;;  %v1253_v56 = vadd.f32 %v3492_v59, %v1252_v48 }
 0x2d8   : > { %v1284_v1 = vmax.f32 %v1258_v60, 0.0 }
 0x2d9   : > { %2917 = vmatpush3.bf16.msra.mxu1 %v3375_v25  ;;  %v2546_v50 = vpop.f32.mrb[28].mxu0  ;;  %v1283_v61 = vmax.f32 %v1253_v56, 0.0 }
 0x2da   : > { %2919 = vmatprep.subr.bf16.mxu1 %v3389_v30  ;;  %v1262_v51 = vpop.f32.mrb[29].mxu0  ;;  %v1268_v2 = vadd.f32 %v2546_v50, %v3492_v59 }
 0x2db   : > { %v1263_v63 = vadd.f32 %v3492_v59, %v1262_v51 }
 0x2dc   : > { %v1286_v6 = vmax.f32 %v1268_v2, 0.0 }
 0x2dd   : > { %2921 = vmatpush3.bf16.msra.mxu1 %v3389_v30  ;;  %v2549_v53 = vpop.f32.mrb[30].mxu0  ;;  %v1285_v4 = vmax.f32 %v1263_v63, 0.0 }
 0x2de   : > { %2923 = vmatprep.subr.bf16.mxu1 %v3402_v34  ;;  %v1272_v54 = vpop.f32.mrb[31].mxu0  ;;  %v1278_v9 = vadd.f32 %v2549_v53, %v3492_v59 }
 0x2df   : > { %v1273_v5 = vadd.f32 %v3492_v59, %v1272_v54 }
 0x2e0   : > { %v1288_v12 = vmax.f32 %v1278_v9, 0.0 }
 0x2e1   : > { %2925 = vmatpush3.bf16.msra.mxu1 %v3402_v34  ;;  %v1287_v10 = vmax.f32 %v1273_v5, 0.0 }
 0x2e2   : > { %2927 = vmatprep.subr.bf16.mxu1 %v3414_v37 }
 0x2e5   : > { %2929 = vmatpush3.bf16.msra.mxu1 %v3414_v37 }
 0x2e6   : > { %2963 = vmatprep.subr.bf16.mxu1 %v3306_v3 }
 0x2e8   : > { %2583 = vmatmul.mubr.f32.vlgmr.msra.gmra.mrb[24].mxu1 %v1282_v0 }
 0x2e9   : > { %2585 = vmatprep.mubr.f32.mxu1 %v1283_v61  ;;  %2965 = vmatpush3.bf16.msra.mxu1 %v3306_v3  ;;  %v1547_v3 = vld [vmem:[%s3343_s29 + $0xc0] sm:$0xff] }
 0x2ea   : > { %2967 = vmatprep.subr.bf16.mxu1 %v3317_v7 }
 0x2ec   : > { %2586 = vmatmul.mubr.f32.gmra.mrb[26].mxu1 %v1284_v1 }
 0x2ed   : > { %2588 = vmatprep.mubr.f32.mxu1 %v1285_v4  ;;  %2969 = vmatpush3.bf16.msra.mxu1 %v3317_v7  ;;  %v1551_v7 = vld [vmem:[%s3343_s29 + $0xe0] sm:$0xff]  ;;  %s3147_s29 = scalar_lea.vmem %s3146_s17, 8192 }
 0x2ee   : > { %3003 = vmatprep.subr.bf16.mxu1 %v3428_v41  ;;  %p3149_p1 = scmp.lt.s32.totalorder %s3147_s29, %s3141_s14 }
 0x2f0   : > { %2589 = vmatmul.mubr.f32.gmra.mrb[28].mxu1 %v1286_v6  ;;  %p3150_p2 = por %p3149_p1, %p3148_p0 }
 0x2f1   : > { %2591 = vmatprep.mubr.f32.mxu1 %v1287_v10 }
 0x2f2   : > { %p3151_p3 = pnand %p3150_p2, %p3144_p13 }
 0x2f4   : > { %2592 = vmatmul.mubr.f32.gmra.mrb[30].mxu1 %v1288_v12 }
 0x2f5   : > { %2646 = vmatprep.mubr.msk.f32.mxu1 %vm333_vm0, %v1547_v3 }
 0x2f8   : > { %2647 = vmatmul.mubr.msk.f32.vlgmr.msra.gmra.mrb[32].mxu1 %vm333_vm0, %v1548_v13 }
 0x2f9   : > { %2649 = vmatprep.mubr.msk.f32.mxu1 %vm333_vm0, %v1549_v15  ;;  %3005 = vmatpush3.bf16.msra.mxu1 %v3428_v41 }
 0x2fa   : > { %3007 = vmatprep.subr.bf16.mxu1 %v3433_v43 }
 0x2fc   : > { %2650 = vmatmul.mubr.msk.f32.gmra.mrb[34].mxu1 %vm333_vm0, %v1550_v16 }
 0x2fd   : > { %2652 = vmatprep.mubr.msk.f32.mxu1 %vm333_vm0, %v1551_v7  ;;  %3009 = vmatpush3.bf16.msra.mxu1 %v3433_v43 }
 0x2fe   : > { %3011 = vmatprep.subr.bf16.mxu1 %v3444_v46 }
 0x300   : > { %2653 = vmatmul.mubr.msk.f32.gmra.mrb[36].mxu1 %vm333_vm0, %v1552_v17 }
 0x301   : > { %2655 = vmatprep.mubr.msk.f32.mxu1 %vm333_vm0, %v1553_v18  ;;  %3013 = vmatpush3.bf16.msra.mxu1 %v3444_v46 }
 0x302   : > { %3015 = vmatprep.subr.bf16.mxu1 %v3454_v49 }
 0x304   : > { %2656 = vmatmul.mubr.msk.f32.gmra.mrb[38].mxu1 %vm333_vm0, %v1554_v19 }
 0x305   : > { %3017 = vmatpush3.bf16.msra.mxu1 %v3454_v49 }
 0x306   : > { %3019 = vmatprep.subr.bf16.mxu1 %v3464_v52 }
 0x309   : > { %3021 = vmatpush3.bf16.msra.mxu1 %v3464_v52 }
 0x30a   : > { %3023 = vmatprep.subr.bf16.mxu1 %v3474_v55 }
 0x30d   : > { %3025 = vmatpush3.bf16.msra.mxu1 %v3474_v55 }
 0x30e   : > { %3027 = vmatprep.subr.bf16.mxu1 %v3484_v58 }
 0x311   : > { %3029 = vmatpush3.bf16.msra.mxu1 %v3484_v58 }
 0x312   : > { %3031 = vmatprep.subr.bf16.mxu1 %v3541_v40 }
 0x315   : > { %3033 = vmatpush3.bf16.msra.mxu1 %v3541_v40 }
 0x39b   : > { %v2520_v41 = vpop.f32.mrb[16].mxu1 }
 0x39c   : > { %v1071_v43 = vadd.f32 %v2520_v41, %v3625_v62  ;;  %v1065_v46 = vpop.f32.mrb[17].mxu1 }
 0x39d   : > { %v1066_v49 = vadd.f32 %v3625_v62, %v1065_v46 }
 0x39e   : > { %v1105_v21 = vmul.f32 0.5, %v1071_v43 }
 0x39f   : > { %v1104_v52 = vmul.f32 0.5, %v1066_v49  ;;  %v2523_v22 = vpop.f32.mrb[18].mxu1 }
 0x3a0   : > { %3091 = vtanh.f32 %v1105_v21  ;;  %v1081_v55 = vadd.f32 %v2523_v22, %v3625_v62  ;;  %v1075_v23 = vpop.f32.mrb[19].mxu1 }
 0x3a1   : > { %3093 = vtanh.f32 %v1104_v52  ;;  %v1076_v58 = vadd.f32 %v3625_v62, %v1075_v23 }
 0x3a2   : > { %v1107_v24 = vmul.f32 0.5, %v1081_v55 }
 0x3a3   : > { %v1106_v26 = vmul.f32 0.5, %v1076_v58  ;;  %v2526_v27 = vpop.f32.mrb[20].mxu1 }
 0x3a4   : > { %3095 = vtanh.f32 %v1107_v24  ;;  %v1091_v40 = vadd.f32 %v2526_v27, %v3625_v62  ;;  %v1085_v28 = vpop.f32.mrb[21].mxu1 }
 0x3a5   : > { %3097 = vtanh.f32 %v1106_v26  ;;  %v1086_v29 = vadd.f32 %v3625_v62, %v1085_v28 }
 0x3a6   : > { %v1109_v31 = vmul.f32 0.5, %v1091_v40 }
 0x3a7   : > { %v1108_v32 = vmul.f32 0.5, %v1086_v29  ;;  %v2529_v33 = vpop.f32.mrb[22].mxu1 }
 0x3a8   : > { %3099 = vtanh.f32 %v1109_v31  ;;  %v1101_v35 = vadd.f32 %v2529_v33, %v3625_v62  ;;  %v1095_v36 = vpop.f32.mrb[23].mxu1 }
 0x3a9   : > { %3101 = vtanh.f32 %v1108_v32  ;;  %v1096_v38 = vadd.f32 %v3625_v62, %v1095_v36 }
 0x3aa   : > { %v3092_v39 = vpop.eup %3091  ;;  %v1111_v44 = vmul.f32 0.5, %v1101_v35 }
 0x3ab   : > { %v3094_v45 = vpop.eup %3093  ;;  %v1121_v47 = vadd.f32 1.0, %v3092_v39  ;;  %v1110_v48 = vmul.f32 0.5, %v1096_v38 }
 0x3ac   : > { %v1120_v50 = vadd.f32 1.0, %v3094_v45  ;;  %3103 = vtanh.f32 %v1111_v44 }
 0x3ad   : > { %v1129_v51 = vmul.f32 0.5, %v1121_v47  ;;  %3105 = vtanh.f32 %v1110_v48 }
 0x3ae   : > { %v3096_v53 = vpop.eup %3095  ;;  %v1128_v54 = vmul.f32 0.5, %v1120_v50 }
 0x3af   : > { %v3098_v56 = vpop.eup %3097  ;;  %1137 = vst [vmem:[%s3638_s18 + $0x48] sm:$0xff] %v1129_v51  ;;  %v1123_v57 = vadd.f32 1.0, %v3096_v53 }
 0x3b0   : > { %1136 = vst [vmem:[%s3638_s18 + $0x40] sm:$0xff] %v1128_v54  ;;  %v1122_v60 = vadd.f32 1.0, %v3098_v56 }
 0x3b1   : > { %v1131_v61 = vmul.f32 0.5, %v1123_v57 }
 0x3b2   : > { %v3100_v63 = vpop.eup %3099  ;;  %v1130_v0 = vmul.f32 0.5, %v1122_v60 }
 0x3b3   : > { %v3102_v1 = vpop.eup %3101  ;;  %1139 = vst [vmem:[%s3638_s18 + $0x58] sm:$0xff] %v1131_v61  ;;  %v1125_v2 = vadd.f32 1.0, %v3100_v63 }
 0x3b4   : > { %1138 = vst [vmem:[%s3638_s18 + $0x50] sm:$0xff] %v1130_v0  ;;  %v1124_v4 = vadd.f32 1.0, %v3102_v1 }
 0x3b5   : > { %v1133_v5 = vmul.f32 0.5, %v1125_v2 }
 0x3b6   : > { %v3104_v6 = vpop.eup %3103  ;;  %v1132_v9 = vmul.f32 0.5, %v1124_v4 }
 0x3b7   : > { %v3106_v10 = vpop.eup %3105  ;;  %1141 = vst [vmem:[%s3638_s18 + $0x68] sm:$0xff] %v1133_v5  ;;  %v1127_v12 = vadd.f32 1.0, %v3104_v6 }
 0x3b8   : > { %1140 = vst [vmem:[%s3638_s18 + $0x60] sm:$0xff] %v1132_v9  ;;  %v1126_v3 = vadd.f32 1.0, %v3106_v10 }
 0x3b9   : > { %v1135_v13 = vmul.f32 0.5, %v1127_v12 }
 0x3ba   : > { %v1134_v15 = vmul.f32 0.5, %v1126_v3 }
 0x3bb   : > { %1143 = vst [vmem:[%s3638_s18 + $0x78] sm:$0xff] %v1135_v13  ;;  %v2584_v16 = vpop.f32.mrb[24].mxu1 }
 0x3bc   : > { %1142 = vst [vmem:[%s3638_s18 + $0x70] sm:$0xff] %v1134_v15  ;;  %v1361_v7 = vadd.f32 %v2584_v16, %v3552_v42  ;;  %v1355_v17 = vpop.f32.mrb[25].mxu1 }
 0x3bd   : > { %v1356_v18 = vadd.f32 %v3552_v42, %v1355_v17 }
 0x3be   : > { %v1395_v43 = vmax.f32 %v1361_v7, 0.0 }
 0x3bf   : > { %v1394_v19 = vmax.f32 %v1356_v18, 0.0  ;;  %v2587_v41 = vpop.f32.mrb[26].mxu1 }
 0x3c0   : > { %v1371_v46 = vadd.f32 %v2587_v41, %v3552_v42  ;;  %v1365_v49 = vpop.f32.mrb[27].mxu1 }
 0x3c1   : > { %2626 = vmatprep.mubr.f32.mxu0 %v1394_v19  ;;  %v1366_v21 = vadd.f32 %v3552_v42, %v1365_v49 }
 0x3c2   : > { %2627 = vmatmul.mubr.f32.vlgmr.msra.gmra.mrb[32].mxu0 %v1395_v43  ;;  %v1397_v52 = vmax.f32 %v1371_v46, 0.0 }
 0x3c3   : > { %2973 = vmatpush3.bf16.msra.mxu0 %v3319_v8  ;;  %v1396_v22 = vmax.f32 %v1366_v21, 0.0  ;;  %v2590_v55 = vpop.f32.mrb[28].mxu1 }
 0x3c4   : > { %2975 = vmatprep.subr.bf16.mxu0 %v3328_v11  ;;  %v1381_v23 = vadd.f32 %v2590_v55, %v3552_v42  ;;  %v1375_v58 = vpop.f32.mrb[29].mxu1 }
 0x3c5   : > { %v1376_v24 = vadd.f32 %v3552_v42, %v1375_v58  ;;  %2629 = vmatprep.mubr.f32.mxu0 %v1396_v22 }
 0x3c6   : > { %v1399_v26 = vmax.f32 %v1381_v23, 0.0  ;;  %2630 = vmatmul.mubr.f32.gmra.mrb[34].mxu0 %v1397_v52 }
 0x3c7   : > { %2977 = vmatpush3.bf16.msra.mxu0 %v3328_v11  ;;  %v1398_v27 = vmax.f32 %v1376_v24, 0.0  ;;  %v2593_v40 = vpop.f32.mrb[30].mxu1 }
 0x3c8   : > { %2979 = vmatprep.subr.bf16.mxu0 %v3346_v14  ;;  %v1391_v8 = vadd.f32 %v2593_v40, %v3552_v42  ;;  %v1385_v28 = vpop.f32.mrb[31].mxu1 }
 0x3c9   : > { %v1386_v29 = vadd.f32 %v3552_v42, %v1385_v28  ;;  %2632 = vmatprep.mubr.f32.mxu0 %v1398_v27 }
 0x3ca   : > { %v1401_v31 = vmax.f32 %v1391_v8, 0.0  ;;  %2633 = vmatmul.mubr.f32.gmra.mrb[36].mxu0 %v1399_v26 }
 0x3cb   : > { %2981 = vmatpush3.bf16.msra.mxu0 %v3346_v14  ;;  %v1400_v32 = vmax.f32 %v1386_v29, 0.0  ;;  %v2648_v33 = vpop.f32.mrb[32].mxu1 }
 0x3cc   : > { %2983 = vmatprep.subr.bf16.mxu0 %v3361_v20  ;;  %v1645_v35 = vpop.f32.mrb[33].mxu1  ;;  %v1651_v48 = vadd.f32 %v2648_v33, %v3492_v59 }
 0x3cd   : > { %2635 = vmatprep.mubr.f32.mxu0 %v1400_v32  ;;  %v1646_v11 = vadd.f32 %v3492_v59, %v1645_v35 }
 0x3ce   : > { %2636 = vmatmul.mubr.f32.gmra.mrb[38].mxu0 %v1401_v31  ;;  %v1685_v51 = vmax.f32 %v1651_v48, 0.0 }
 0x3cf   : > { %2985 = vmatpush3.bf16.msra.mxu0 %v3361_v20  ;;  %v1684_v36 = vmax.f32 %v1646_v11, 0.0  ;;  %v2651_v38 = vpop.f32.mrb[34].mxu1 }
 0x3d0   : > { %2987 = vmatprep.subr.bf16.mxu0 %v3375_v25  ;;  %v1655_v39 = vpop.f32.mrb[35].mxu1 }
 0x3d1   : > { %2690 = vmatprep.mubr.f32.mxu0 %v1684_v36  ;;  %v1656_v20 = vadd.f32 %v3492_v59, %v1655_v39 }
 0x3d3   : > { %2989 = vmatpush3.bf16.msra.mxu0 %v3375_v25  ;;  %v2654_v14 = vpop.f32.mrb[36].mxu1  ;;  %v1686_v50 = vmax.f32 %v1656_v20, 0.0 }
 0x3d4   : > { %2991 = vmatprep.subr.bf16.mxu0 %v3389_v30  ;;  %v1665_v44 = vpop.f32.mrb[37].mxu1  ;;  %v1671_v56 = vadd.f32 %v2654_v14, %v3492_v59 }
 0x3d5   : > { %v1666_v25 = vadd.f32 %v3492_v59, %v1665_v44 }
 0x3d6   : > { %v1689_v60 = vmax.f32 %v1671_v56, 0.0 }
 0x3d7   : > { %2993 = vmatpush3.bf16.msra.mxu0 %v3389_v30  ;;  %v2657_v45 = vpop.f32.mrb[38].mxu1  ;;  %v1661_v30 = vadd.f32 %v2651_v38, %v3492_v59  ;;  %v1688_v53 = vmax.f32 %v1666_v25, 0.0 }
 0x3d8   : > { %2995 = vmatprep.subr.bf16.mxu0 %v3402_v34  ;;  %v1675_v47 = vpop.f32.mrb[39].mxu1 }
 0x3d9   : > { %v1676_v54 = vadd.f32 %v3492_v59, %v1675_v47 }
 0x3db   : > { %2997 = vmatpush3.bf16.msra.mxu0 %v3402_v34  ;;  %v1687_v34 = vmax.f32 %v1661_v30, 0.0  ;;  %v1690_v57 = vmax.f32 %v1676_v54, 0.0 }
 0x3dc   : > { %2999 = vmatprep.subr.bf16.mxu0 %v3414_v37 }
 0x3df   : > { %3001 = vmatpush3.bf16.msra.mxu0 %v3414_v37  ;;  %v3139_v37 = vld [vmem:[%s3855_s2] ss:$0 sm:$0xff] }
 0x3e0   : > { %v1681_v61 = vadd.f32 %v3139_v37, %v2657_v45 }
 0x3e2   : > { %2691 = vmatmul.mubr.f32.vlgmr.msra.gmra.mrb[40].mxu0 %v1685_v51  ;;  %v1691_v63 = vmax.f32 %v1681_v61, 0.0 }
 0x3e3   : > { %2693 = vmatprep.mubr.f32.mxu0 %v1686_v50 }
 0x3e6   : > { %2694 = vmatmul.mubr.f32.gmra.mrb[42].mxu0 %v1687_v34  ;;  %v3140_v34 = vld [vmem:[%s3857_s4] ss:$0 sm:$0xff] }
 0x3e7   : > { %2696 = vmatprep.mubr.f32.mxu0 %v1688_v53 }
 0x3ea   : > { %2697 = vmatmul.mubr.f32.gmra.mrb[44].mxu0 %v1689_v60 }
 0x3eb   : > { %2699 = vmatprep.mubr.f32.mxu0 %v1690_v57 }
 0x3ee   : > { %2700 = vmatmul.mubr.f32.gmra.mrb[46].mxu0 %v1691_v63 }
 0x495   : > { %v2628_v0 = vpop.f32.mrb[32].mxu0 }
 0x496   : > { %v1474_v1 = vadd.f32 %v2628_v0, %v3625_v62  ;;  %v1468_v2 = vpop.f32.mrb[33].mxu0 }
 0x497   : > { %v1469_v4 = vadd.f32 %v3625_v62, %v1468_v2 }
 0x498   : > { %v1508_v59 = vmul.f32 0.5, %v1474_v1 }
 0x499   : > { %v1507_v5 = vmul.f32 0.5, %v1469_v4  ;;  %v2631_v6 = vpop.f32.mrb[34].mxu0 }
 0x49a   : > { %3107 = vtanh.f32 %v1508_v59  ;;  %v1484_v9 = vadd.f32 %v2631_v6, %v3625_v62  ;;  %v1478_v10 = vpop.f32.mrb[35].mxu0 }
 0x49b   : > { %3109 = vtanh.f32 %v1507_v5  ;;  %v1479_v12 = vadd.f32 %v3625_v62, %v1478_v10 }
 0x49c   : > { %v1510_v3 = vmul.f32 0.5, %v1484_v9 }
 0x49d   : > { %v1509_v13 = vmul.f32 0.5, %v1479_v12  ;;  %v2634_v15 = vpop.f32.mrb[36].mxu0 }
 0x49e   : > { %3111 = vtanh.f32 %v1510_v3  ;;  %v1494_v16 = vadd.f32 %v2634_v15, %v3625_v62  ;;  %v1488_v7 = vpop.f32.mrb[37].mxu0 }
 0x49f   : > { %3113 = vtanh.f32 %v1509_v13  ;;  %v1489_v17 = vadd.f32 %v3625_v62, %v1488_v7 }
 0x4a0   : > { %v1512_v18 = vmul.f32 0.5, %v1494_v16 }
 0x4a1   : > { %v1511_v19 = vmul.f32 0.5, %v1489_v17  ;;  %v2637_v41 = vpop.f32.mrb[38].mxu0 }
 0x4a2   : > { %3115 = vtanh.f32 %v1512_v18  ;;  %v1504_v43 = vadd.f32 %v2637_v41, %v3625_v62  ;;  %v1498_v46 = vpop.f32.mrb[39].mxu0 }
 0x4a3   : > { %3117 = vtanh.f32 %v1511_v19  ;;  %v1499_v49 = vadd.f32 %v3625_v62, %v1498_v46 }
 0x4a4   : > { %v3108_v21 = vpop.eup %3107  ;;  %v1514_v52 = vmul.f32 0.5, %v1504_v43 }
 0x4a5   : > { %v3110_v22 = vpop.eup %3109  ;;  %v1524_v55 = vadd.f32 1.0, %v3108_v21  ;;  %v1513_v23 = vmul.f32 0.5, %v1499_v49 }
 0x4a6   : > { %v1523_v58 = vadd.f32 1.0, %v3110_v22  ;;  %3119 = vtanh.f32 %v1514_v52 }
 0x4a7   : > { %v1532_v24 = vmul.f32 0.5, %v1524_v55  ;;  %3121 = vtanh.f32 %v1513_v23 }
 0x4a8   : > { %v3112_v26 = vpop.eup %3111  ;;  %v1531_v27 = vmul.f32 0.5, %v1523_v58 }
 0x4a9   : > { %v3114_v40 = vpop.eup %3113  ;;  %1540 = vst [vmem:[%s3638_s18 + $0x88] sm:$0xff] %v1532_v24  ;;  %v1526_v8 = vadd.f32 1.0, %v3112_v26 }
 0x4aa   : > { %1539 = vst [vmem:[%s3638_s18 + $0x80] sm:$0xff] %v1531_v27  ;;  %v1525_v28 = vadd.f32 1.0, %v3114_v40 }
 0x4ab   : > { %v1534_v29 = vmul.f32 0.5, %v1526_v8 }
 0x4ac   : > { %v3116_v31 = vpop.eup %3115  ;;  %v1533_v32 = vmul.f32 0.5, %v1525_v28 }
 0x4ad   : > { %v3118_v33 = vpop.eup %3117  ;;  %1542 = vst [vmem:[%s3638_s18 + $0x98] sm:$0xff] %v1534_v29  ;;  %v1528_v35 = vadd.f32 1.0, %v3116_v31 }
 0x4ae   : > { %1541 = vst [vmem:[%s3638_s18 + $0x90] sm:$0xff] %v1533_v32  ;;  %v1527_v11 = vadd.f32 1.0, %v3118_v33 }
 0x4af   : > { %v1536_v36 = vmul.f32 0.5, %v1528_v35 }
 0x4b0   : > { %v3120_v38 = vpop.eup %3119  ;;  %v1535_v39 = vmul.f32 0.5, %v1527_v11 }
 0x4b1   : > { %v3122_v14 = vpop.eup %3121  ;;  %1544 = vst [vmem:[%s3638_s18 + $0xa8] sm:$0xff] %v1536_v36  ;;  %v1530_v44 = vadd.f32 1.0, %v3120_v38 }
 0x4b2   : > { %1543 = vst [vmem:[%s3638_s18 + $0xa0] sm:$0xff] %v1535_v39  ;;  %v1529_v45 = vadd.f32 1.0, %v3122_v14 }
 0x4b3   : > { %v1538_v47 = vmul.f32 0.5, %v1530_v44 }
 0x4b4   : > { %v1537_v20 = vmul.f32 0.5, %v1529_v45 }
 0x4b5   : > { %1546 = vst [vmem:[%s3638_s18 + $0xb8] sm:$0xff] %v1538_v47  ;;  %v2692_v48 = vpop.f32.mrb[40].mxu0 }
 0x4b6   : > { %1545 = vst [vmem:[%s3638_s18 + $0xb0] sm:$0xff] %v1537_v20  ;;  %v1764_v50 = vadd.f32 %v2692_v48, %v3552_v42  ;;  %v1758_v25 = vpop.f32.mrb[41].mxu0 }
 0x4b7   : > { %v1759_v51 = vadd.f32 %v3552_v42, %v1758_v25 }
 0x4b8   : > { %v1798_v54 = vmax.f32 %v1764_v50, 0.0 }
 0x4b9   : > { %v1797_v30 = vmax.f32 %v1759_v51, 0.0  ;;  %v2695_v53 = vpop.f32.mrb[42].mxu0 }
 0x4ba   : > { %v1774_v56 = vadd.f32 %v3140_v34, %v2695_v53  ;;  %v1768_v57 = vpop.f32.mrb[43].mxu0 }
 0x4bb   : > { %v1769_v60 = vadd.f32 %v3140_v34, %v1768_v57  ;;  %2734 = vmatprep.mubr.f32.mxu1 %v1797_v30 }
 0x4bc   : > { %2735 = vmatmul.mubr.f32.vlgmr.msra.gmra.mrb[40].mxu1 %v1798_v54  ;;  %v1800_v63 = vmax.f32 %v1774_v56, 0.0 }
 0x4bd   : > { %v1799_v37 = vmax.f32 %v1769_v60, 0.0  ;;  %v2698_v61 = vpop.f32.mrb[44].mxu0 }
 0x4be   : > { %v1784_v0 = vadd.f32 %v3140_v34, %v2698_v61  ;;  %v1778_v1 = vpop.f32.mrb[45].mxu0 }
 0x4bf   : > { %v1779_v2 = vadd.f32 %v3140_v34, %v1778_v1  ;;  %2737 = vmatprep.mubr.f32.mxu1 %v1799_v37 }
 0x4c0   : > { %2738 = vmatmul.mubr.f32.gmra.mrb[42].mxu1 %v1800_v63  ;;  %v1802_v59 = vmax.f32 %v1784_v0, 0.0 }
 0x4c1   : > { %v1801_v42 = vmax.f32 %v1779_v2, 0.0  ;;  %v2701_v4 = vpop.f32.mrb[46].mxu0 }
 0x4c2   : > { %v1794_v5 = vadd.f32 %v3140_v34, %v2701_v4  ;;  %v1788_v6 = vpop.f32.mrb[47].mxu0 }
 0x4c3   : > { %v1789_v9 = vadd.f32 %v3140_v34, %v1788_v6  ;;  %2740 = vmatprep.mubr.f32.mxu1 %v1801_v42 }
 0x4c4   : > { %2741 = vmatmul.mubr.f32.gmra.mrb[44].mxu1 %v1802_v59  ;;  %v1804_v12 = vmax.f32 %v1794_v5, 0.0 }
 0x4c5   : > { %v1803_v10 = vmax.f32 %v1789_v9, 0.0 }
 0x4c7   : > { %2743 = vmatprep.mubr.f32.mxu1 %v1803_v10 }
 0x4c8   : > { %2744 = vmatmul.mubr.f32.gmra.mrb[46].mxu1 %v1804_v12 }
 0x58f   : > { %v2736_v3 = vpop.f32.mrb[40].mxu1 }
 0x590   : > { %v1877_v13 = vadd.f32 %v2736_v3, %v3625_v62  ;;  %v1871_v15 = vpop.f32.mrb[41].mxu1 }
 0x591   : > { %v1872_v16 = vadd.f32 %v3625_v62, %v1871_v15 }
 0x592   : > { %v1911_v7 = vmul.f32 0.5, %v1877_v13 }
 0x593   : > { %v1910_v17 = vmul.f32 0.5, %v1872_v16  ;;  %v2739_v18 = vpop.f32.mrb[42].mxu1 }
 0x594   : > { %3123 = vtanh.f32 %v1911_v7  ;;  %v1887_v19 = vadd.f32 %v2739_v18, %v3625_v62  ;;  %v1881_v41 = vpop.f32.mrb[43].mxu1 }
 0x595   : > { %3125 = vtanh.f32 %v1910_v17  ;;  %v1882_v43 = vadd.f32 %v3625_v62, %v1881_v41 }
 0x596   : > { %v1913_v46 = vmul.f32 0.5, %v1887_v19 }
 0x597   : > { %v1912_v49 = vmul.f32 0.5, %v1882_v43  ;;  %v2742_v21 = vpop.f32.mrb[44].mxu1 }
 0x598   : > { %3127 = vtanh.f32 %v1913_v46  ;;  %v1897_v52 = vadd.f32 %v2742_v21, %v3625_v62  ;;  %v1891_v22 = vpop.f32.mrb[45].mxu1 }
 0x599   : > { %3129 = vtanh.f32 %v1912_v49  ;;  %v1892_v55 = vadd.f32 %v3625_v62, %v1891_v22 }
 0x59a   : > { %v1915_v23 = vmul.f32 0.5, %v1897_v52 }
 0x59b   : > { %v1914_v58 = vmul.f32 0.5, %v1892_v55  ;;  %v2745_v24 = vpop.f32.mrb[46].mxu1 }
 0x59c   : > { %3131 = vtanh.f32 %v1915_v23  ;;  %v1907_v26 = vadd.f32 %v2745_v24, %v3625_v62  ;;  %v1901_v27 = vpop.f32.mrb[47].mxu1 }
 0x59d   : > { %3133 = vtanh.f32 %v1914_v58  ;;  %v1902_v40 = vadd.f32 %v3625_v62, %v1901_v27 }
 0x59e   : > { %v3124_v8 = vpop.eup %3123  ;;  %v1917_v28 = vmul.f32 0.5, %v1907_v26 }
 0x59f   : > { %v3126_v29 = vpop.eup %3125  ;;  %v1927_v31 = vadd.f32 1.0, %v3124_v8  ;;  %v1916_v32 = vmul.f32 0.5, %v1902_v40 }
 0x5a0   : > { %v1926_v33 = vadd.f32 1.0, %v3126_v29  ;;  %3135 = vtanh.f32 %v1917_v28 }
 0x5a1   : > { %v1935_v35 = vmul.f32 0.5, %v1927_v31  ;;  %3137 = vtanh.f32 %v1916_v32 }
 0x5a2   : > { %v3128_v11 = vpop.eup %3127  ;;  %v1934_v36 = vmul.f32 0.5, %v1926_v33 }
 0x5a3   : > { %v3130_v38 = vpop.eup %3129  ;;  %1943 = vst [vmem:[%s3638_s18 + $0xc8] sm:$0xff] %v1935_v35  ;;  %v1929_v39 = vadd.f32 1.0, %v3128_v11 }
 0x5a4   : > { %1942 = vst [vmem:[%s3638_s18 + $0xc0] sm:$0xff] %v1934_v36  ;;  %v1928_v62 = vadd.f32 1.0, %v3130_v38 }
 0x5a5   : > { %v1937_v14 = vmul.f32 0.5, %v1929_v39 }
 0x5a6   : > { %v3132_v44 = vpop.eup %3131  ;;  %v1936_v45 = vmul.f32 0.5, %v1928_v62 }
 0x5a7   : > { %v3134_v47 = vpop.eup %3133  ;;  %1945 = vst [vmem:[%s3638_s18 + $0xd8] sm:$0xff] %v1937_v14  ;;  %v1931_v20 = vadd.f32 1.0, %v3132_v44 }
 0x5a8   : > { %1944 = vst [vmem:[%s3638_s18 + $0xd0] sm:$0xff] %v1936_v45  ;;  %v1930_v48 = vadd.f32 1.0, %v3134_v47 }
 0x5a9   : > { %v1939_v50 = vmul.f32 0.5, %v1931_v20 }
 0x5aa   : > { %v3136_v25 = vpop.eup %3135  ;;  %v1938_v51 = vmul.f32 0.5, %v1930_v48 }
 0x5ab   : > { %v3138_v30 = vpop.eup %3137  ;;  %1947 = vst [vmem:[%s3638_s18 + $0xe8] sm:$0xff] %v1939_v50  ;;  %v1933_v53 = vadd.f32 1.0, %v3136_v25 }
 0x5ac   : > { %1946 = vst [vmem:[%s3638_s18 + $0xe0] sm:$0xff] %v1938_v51  ;;  %v1932_v54 = vadd.f32 1.0, %v3138_v30 }
 0x5ad   : > { %v1941_v34 = vmul.f32 0.5, %v1933_v53 }
 0x5ae   : > { %v1940_v56 = vmul.f32 0.5, %v1932_v54 }
 0x5af   : > { %1949 = vst [vmem:[%s3638_s18 + $0xf8] sm:$0xff] %v1941_v34 }
 0x5b0   : > { %1948 = vst [vmem:[%s3638_s18 + $0xf0] sm:$0xff] %v1940_v56 }
 0x5b1   : > { %3154 = shalt.err (!%p3151_p3)
}
 0x5b2   : > { %s3155_s16 = scalar_lea.hbm %s3804_s13, 4096  ;;  %s3159_s21 = scalar_lea.hbm %s3860_s7, 16384 }
 0x5b3   : > { %p3156_p4 = scmp.ne.s32.totalorder %s3804_s13, %s3155_s16  ;;  %p3160_p9 = scmp.lt.u32.totalorder %s3804_s13, %s3860_s7 }
 0x5b4   : > { %p3161_p10 = scmp.lt.u32.totalorder %s3159_s21, %s3155_s16  ;;  %p3163_p12 = scmp.lt.u32.totalorder %s3155_s16, %s3804_s13 }
 0x5b5   : > { %p3157_p7 = pnand %p3156_p4, %p3286_p5 }
 0x5b6   : > { %p3162_p11 = por %p3161_p10, %p3160_p9 }
 0x5b7   : > { %p3158_p8 = pneg %p3157_p7 }
 0x5b8   : > { %p3164_p13 = por %p3163_p12, %p3162_p11 }
 0x5ba   : > { %p3165_p0 = pnand %p3164_p13, %p3158_p8 }
 0x5bc   : > { %3168 = shalt.err (!%p3165_p0)
}
 0x5bd   : > { %s3206_s19 = smov 128   ;;  %s3207_s9 = smov 8  }
 0x5be   : > { %3034 = dma.vmem_to_hbm [thread:$0]  (%p3286_p5), %s3806_s8, 4096, %s3804_s13, %s3812_s28, %s3206_s19, %s3206_s19, %s3207_s9  }
 0x5bf PF: > { %p3040_p1 = scmp.ge.s32.totalorder %s3203_s27, 2  ;;  %s1979_s14 = sand.u32 1, %s3191_s24  }
 0x5c0   : > { %s1980_s15 = scalar_lea.sflag [#allocation3], %s1979_s14 }
 0x5c1   : > { %p3037_p2 = pnand %p3040_p1, %p3290_p6 }
 0x5c3   : > { %3186 = dma.done.wait (!%p3037_p2), %s1980_s15, 4096  }
 0x5c4   : > { %3188 = vsyncadd (!%p3037_p2), %s1980_s15, 4294963200  ;;  %p17_p3 = scmp.ge.s32.totalorder %s3273_s30, 6   ;;  %s3863_s24 = smov %s3195_s25 }
 0x5c5   : > { %s3864_s25 = smov %s3199_s26  ;;  %s3865_s26 = smov %s3284_s10 }
 0x5c6   : > { %s3866_s27 = smov %s3273_s30  ;;  %19 = sbr.rel (!%p17_p3) target bundleno = 3 (0x3), region = 83 }
 0x5cd   :  { %1985 = vsyncpa [#allocation3], 1 }
 0x5ce   :  { %1987 = vsyncpa [#allocation3 + $0x1], 1 }

</bundles_post_ra>
